<compile_context>
chip_gen: v6e
topology: v6e:2x2x1
jax: 0.10.0
libtpu: 0.0.40
codegen_flags: <defaults>
</compile_context>

<pallas_src>
import math
import functools

import jax
import jax.numpy as jnp
from jax.experimental import pallas as pl
from jax.experimental.pallas import tpu as pltpu


_F32_EPS = float(jnp.finfo(jnp.float32).eps)
_VMEM_LIMIT = 32 * 1024 * 1024          # safe on v5e/v6e (128 MiB) and v7x (64 MiB)


# ----------------------------- config ---------------------------------------
class NanoConfig:
    vocab_size = 128
    d_model = 32
    n_layers = 2
    n_heads = 2
    expand_v = 1          # value head dim multiplier
    conv_size = 4         # short conv kernel size
    layer_norm_scaling = True
    fused_loss_computation = False


def _round_up(x, m):
    return ((x + m - 1) // m) * m


def _cparams(dims):
    return pltpu.CompilerParams(dimension_semantics=dims,
                                vmem_limit_bytes=_VMEM_LIMIT)


def _row_block(n_rows, d, elem_bytes=4, budget=4 << 20):
    """Row-block for the norm kernels, capped so double-buffered tiles stay small."""
    cap = max(8, ((budget // max(elem_bytes * d, 1)) // 8) * 8)
    return min(_round_up(n_rows, 8), min(cap, 1024))


# ----------------------------- tiled matmul ----------------------------------
def _matmul_kernel(a_ref, b_ref, o_ref, acc_ref, *, act, norm):
    @pl.when(pl.program_id(2) == 0)
    def _():
        acc_ref[...] = jnp.zeros_like(acc_ref)

    a = a_ref[...]
    if norm is not None:                         # fused scale*rms_norm prologue
        d_true, scale, eps = norm                # (only used with a single K block)
        a = a.astype(jnp.float32)
        ms = jnp.sum(a * a, axis=-1, keepdims=True) * (1.0 / d_true)
        a = a * jax.lax.rsqrt(ms + eps) * scale
    a = a.astype(jnp.bfloat16)

    acc_ref[...] += jnp.dot(a, b_ref[...], preferred_element_type=jnp.float32)

    @pl.when(pl.program_id(2) == pl.num_programs(2) - 1)
    def _():
        y = acc_ref[...]
        if act is not None:                      # static python branch
            y = act(y)
        o_ref[...] = y.astype(o_ref.dtype)


def pallas_matmul(a, b, *, act=None, norm=None, out_dtype=jnp.bfloat16):
    """(M, K) @ (Kb, N) -> (M, N); b may be pre-padded along K (Kb >= K, zero rows).
    bf16 MXU inputs, fp32 accumulation; optional fused rms-norm prologue `norm`
    = (true_feature_dim, scale, eps) and fused elementwise epilogue `act`."""
    M, K = a.shape
    Kb, N = b.shape
    assert Kb >= K
    if b.dtype != jnp.bfloat16:
        b = b.astype(jnp.bfloat16)
    if norm is None and a.dtype != jnp.bfloat16:
        a = a.astype(jnp.bfloat16)

    tm = min(_round_up(M, 16), 256)       # 16: bf16 sublane packing
    tn = min(_round_up(N, 128), 512)
    if norm is not None:
        tk = _round_up(Kb, 128)           # norm needs the full feature axis in one block
    else:
        tk = min(_round_up(Kb, 128), 512)
    Mp, Np, Kp = _round_up(M, tm), _round_up(N, tn), _round_up(Kb, tk)
    if (Mp, Kp) != (M, K):
        a = jnp.pad(a, ((0, Mp - M), (0, Kp - K)))
    if (Kp, Np) != (Kb, N):
        b = jnp.pad(b, ((0, Kp - Kb), (0, Np - N)))

    out = pl.pallas_call(
        functools.partial(_matmul_kernel, act=act, norm=norm),
        out_shape=jax.ShapeDtypeStruct((Mp, Np), out_dtype),
        grid=(Mp // tm, Np // tn, Kp // tk),
        in_specs=[pl.BlockSpec((tm, tk), lambda i, j, k: (i, k)),
                  pl.BlockSpec((tk, tn), lambda i, j, k: (k, j))],
        out_specs=pl.BlockSpec((tm, tn), lambda i, j, k: (i, j)),
        scratch_shapes=[pltpu.VMEM((tm, tn), jnp.float32)],
        compiler_params=_cparams(("parallel", "parallel", "arbitrary")),
    )(a, b)
    if (Mp, Np) != (M, N):
        out = out[:M, :N]
    return out


def _relu_sq(z):
    return jnp.square(jnp.maximum(z, 0.0))


# ----------------------------- RMS norms --------------------------------------
def _rmsnorm_kernel(x_ref, o_ref, *, eps, scale):
    x = x_ref[...].astype(jnp.float32)
    ms = jnp.mean(x * x, axis=-1, keepdims=True)
    o_ref[...] = (x * jax.lax.rsqrt(ms + eps) * scale).astype(o_ref.dtype)


def rms_norm(x, scale=1.0, eps=_F32_EPS):
    """scale * F.rms_norm(x, (x.size(-1),)) (no learned weight); standalone kernel
    (only used on the residual stream right after the embedding)."""
    shp = x.shape
    d = shp[-1]
    x2 = x.reshape(-1, d)
    n = x2.shape[0]
    br = _row_block(n, d)
    npad = _round_up(n, br)
    if npad != n:
        x2 = jnp.pad(x2, ((0, npad - n), (0, 0)))
    out = pl.pallas_call(
        functools.partial(_rmsnorm_kernel, eps=eps, scale=float(scale)),
        out_shape=jax.ShapeDtypeStruct((npad, d), jnp.float32),
        grid=(npad // br,),
        in_specs=[pl.BlockSpec((br, d), lambda i: (i, 0))],
        out_specs=pl.BlockSpec((br, d), lambda i: (i, 0)),
        compiler_params=_cparams(("parallel",)),
    )(x2)
    if npad != n:
        out = out[:n]
    return out.reshape(shp)


def _gated_rmsnorm_kernel(x_ref, g_ref, w_ref, o_ref, *, eps):
    x = x_ref[...].astype(jnp.float32)
    g = g_ref[...].astype(jnp.float32)
    ms = jnp.mean(x * x, axis=-1, keepdims=True)
    y = x * jax.lax.rsqrt(ms + eps) * w_ref[...]
    o_ref[...] = (y * (g * jax.nn.sigmoid(g))).astype(o_ref.dtype)


def gated_rms_norm(o, gate, w, eps=1e-5):
    """rmsnorm(o) * w * silu(gate), per-head normalization; bf16 output (o-proj input)."""
    shp = o.shape
    d = shp[-1]
    o2 = o.reshape(-1, d)
    g2 = gate.reshape(-1, d)
    n = o2.shape[0]
    br = _row_block(n, d)
    npad = _round_up(n, br)
    if npad != n:
        o2 = jnp.pad(o2, ((0, npad - n), (0, 0)))
        g2 = jnp.pad(g2, ((0, npad - n), (0, 0)))
    out = pl.pallas_call(
        functools.partial(_gated_rmsnorm_kernel, eps=eps),
        out_shape=jax.ShapeDtypeStruct((npad, d), jnp.bfloat16),
        grid=(npad // br,),
        in_specs=[pl.BlockSpec((br, d), lambda i: (i, 0)),
                  pl.BlockSpec((br, d), lambda i: (i, 0)),
                  pl.BlockSpec((1, d), lambda i: (0, 0))],
        out_specs=pl.BlockSpec((br, d), lambda i: (i, 0)),
        compiler_params=_cparams(("parallel",)),
    )(o2, g2, w.reshape(1, d).astype(jnp.float32))
    if npad != n:
        out = out[:n]
    return out.reshape(shp)


# ----------------------------- gated delta rule (chunkwise) -------------------
def _softplus(x):
    return jnp.where(x > 20.0, x, jnp.log(1.0 + jnp.exp(jnp.minimum(x, 20.0))))


def _dot_nt(a, b):    # a @ b.T (contract trailing dims)
    return jax.lax.dot_general(a, b, (((1,), (1,)), ((), ())),
                               preferred_element_type=jnp.float32)


def _dot_tn(a, b):    # a.T @ b (contract leading dims)
    return jax.lax.dot_general(a, b, (((0,), (0,)), ((), ())),
                               preferred_element_type=jnp.float32)


def _gdn_kernel(qkv_ref, ba_ref, hp_ref, o_ref, state_ref, *, n_heads, dk, dv, chunk):
    """Chunkwise gated delta rule.  Grid = (batch, num_chunks); all heads handled
    per step with per-head state in a (H, dk, dv) VMEM scratch.

    Per head, with alpha_t = exp(g_t), the recurrence
        S_t = alpha_t S_{t-1} + k_t^T beta_t (v_t - k_t alpha_t S_{t-1}),  o_t = q_t S_t
    is solved over a chunk of C steps with matmuls:
        G      = within-chunk inclusive cumsum of g
        M[t,s] = beta_t exp(G_t - G_s) (k_t.k_s)   for t > s    (strictly lower)
        U      = (I + M)^{-1} (beta*V - beta*exp(G) * (K S_0))
        O      = exp(G) * (Q S_0) + ([t>=s] exp(G_t - G_s) * Q K^T) U
        S_new  = exp(G_C) S_0 + (exp(G_C - G) * K)^T U
    (I + M)^{-1} of the nilpotent strictly-lower M is built via Neumann-series
    doubling: log2(C) pairs of (C,C) matmuls.
    """
    f32 = jnp.float32
    C = chunk
    HK = n_heads * dk

    @pl.when(pl.program_id(1) == 0)
    def _():
        state_ref[...] = jnp.zeros_like(state_ref)

    row = jax.lax.broadcasted_iota(jnp.int32, (C, C), 0)
    col = jax.lax.broadcasted_iota(jnp.int32, (C, C), 1)
    m_strict = row > col
    m_incl = row >= col
    eye = (row == col).astype(f32)
    tri = m_incl.astype(f32)
    ones_c1 = jnp.ones((C, 1), f32)
    neg_big = jnp.float32(-1e30)

    o_parts = []
    for h in range(n_heads):                      # static loop; all slices static
        q_h = qkv_ref[0, :, h * dk:(h + 1) * dk].astype(f32)                # (C, dk)
        k_h = qkv_ref[0, :, HK + h * dk:HK + (h + 1) * dk].astype(f32)      # (C, dk)
        v_h = qkv_ref[0, :, 2 * HK + h * dv:2 * HK + (h + 1) * dv].astype(f32)  # (C, dv)
        b_raw = ba_ref[0, :, h:h + 1].astype(f32)                           # (C, 1)
        a_raw = ba_ref[0, :, n_heads + h:n_heads + h + 1].astype(f32)       # (C, 1)

        # fused conv activation (silu) + fla-style per-head L2 norm + q scaling
        q_h = q_h * jax.nn.sigmoid(q_h)
        k_h = k_h * jax.nn.sigmoid(k_h)
        v_h = v_h * jax.nn.sigmoid(v_h)
        q_h = q_h * jax.lax.rsqrt(jnp.sum(q_h * q_h, -1, keepdims=True) + 1e-6)
        q_h = q_h * (dk ** -0.5)
        k_h = k_h * jax.lax.rsqrt(jnp.sum(k_h * k_h, -1, keepdims=True) + 1e-6)

        # fused per-head gating scalars
        a_coef = jnp.exp(hp_ref[0:1, h:h + 1].astype(f32))                  # (1, 1)
        dt_b = hp_ref[1:2, h:h + 1].astype(f32)                             # (1, 1)
        beta = jax.nn.sigmoid(b_raw)                                        # (C, 1)
        g = -a_coef * _softplus(a_raw + dt_b)                               # (C, 1) log-decay

        # within-chunk cumulative decay and decay matrices (always exp of <= 0)
        Gc = jnp.dot(tri, g, preferred_element_type=f32)                    # (C, 1)
        g_tot = jnp.sum(g, axis=0, keepdims=True)                           # (1, 1)
        Gc_cols = _dot_nt(ones_c1, Gc)                                      # (C, C) = Gc[s]
        diff = Gc - Gc_cols                                                 # Gc[t] - Gc[s]
        d_incl = jnp.exp(jnp.where(m_incl, diff, neg_big))
        d_strict = jnp.exp(jnp.where(m_strict, diff, neg_big))

        S0 = state_ref[h]                                                   # (dk, dv)

        # (I + M)^{-1} via Neumann-series doubling of the nilpotent -M
        Mm = beta * d_strict * _dot_nt(k_h, k_h)                            # (C, C)
        Npow = -Mm
        Tinv = eye + Npow
        m = 2
        while m < C:                                                        # static loop
            Npow = jnp.dot(Npow, Npow, preferred_element_type=f32)
            Tinv = Tinv + jnp.dot(Tinv, Npow, preferred_element_type=f32)
            m *= 2

        rhs = beta * v_h - (beta * jnp.exp(Gc)) * jnp.dot(
            k_h, S0, preferred_element_type=f32)                            # (C, dv)
        u = jnp.dot(Tinv, rhs, preferred_element_type=f32)                  # (C, dv)

        o_h = jnp.exp(Gc) * jnp.dot(q_h, S0, preferred_element_type=f32) + \
              jnp.dot(d_incl * _dot_nt(q_h, k_h), u, preferred_element_type=f32)

        k_dec = jnp.exp(g_tot - Gc) * k_h                                   # (C, dk)
        state_ref[h] = jnp.exp(g_tot) * S0 + _dot_tn(k_dec, u)              # (dk, dv)
        o_parts.append(o_h)

    o_full = o_parts[0] if n_heads == 1 else jnp.concatenate(o_parts, axis=-1)
    o_ref[0] = o_full.astype(o_ref.dtype)        # single lane-dense (C, H*dv) store


def gated_delta_rule(qkv_conv, ba_raw, head_params, *, n_heads, dk, dv):
    """qkv_conv: (B, T, 2*H*dk + H*dv) bf16 (post-conv, pre-silu)
       ba_raw  : (B, T, 2H) f32 raw [b | a] projections
       head_params: (2, H) f32 [A_log; dt_bias]           -> (B, T, H*dv) f32."""
    B, T, CIN = qkv_conv.shape
    HV = n_heads * dv
    C = _round_up(T, 8) if T <= 64 else 64       # chunk length
    Tp = _round_up(T, C)
    if Tp != T:
        qkv_conv = jnp.pad(qkv_conv, ((0, 0), (0, Tp - T), (0, 0)))
        ba_raw = jnp.pad(ba_raw, ((0, 0), (0, Tp - T), (0, 0)))
    out = pl.pallas_call(
        functools.partial(_gdn_kernel, n_heads=n_heads, dk=dk, dv=dv, chunk=C),
        out_shape=jax.ShapeDtypeStruct((B, Tp, HV), jnp.float32),
        grid=(B, Tp // C),
        in_specs=[pl.BlockSpec((1, C, CIN), lambda b, c: (b, c, 0)),
                  pl.BlockSpec((1, C, 2 * n_heads), lambda b, c: (b, c, 0)),
                  pl.BlockSpec((2, n_heads), lambda b, c: (0, 0))],
        out_specs=pl.BlockSpec((1, C, HV), lambda b, c: (b, c, 0)),
        scratch_shapes=[pltpu.VMEM((n_heads, dk, dv), jnp.float32)],
        compiler_params=_cparams(("parallel", "arbitrary")),
    )(qkv_conv, ba_raw, head_params.astype(jnp.float32))
    if Tp != T:
        out = out[:, :T]
    return out


# ----------------------------- JAX glue --------------------------------------
def causal_conv1d(x, w):
    """Depthwise causal conv. x: (B, T, C), w: (C, K) (PyTorch NCL conv1d, groups=C)."""
    K = w.shape[-1]
    T = x.shape[1]
    xp = jnp.pad(x.astype(jnp.float32), ((0, 0), (K - 1, 0), (0, 0)))
    out = jnp.zeros(x.shape, jnp.float32)
    for i in range(K):
        out = out + xp[:, i:i + T, :] * w[None, None, :, i]
    return out.astype(jnp.bfloat16)
# TODO(synk): fuse the 4-tap conv into the GDN kernel prologue (needs K-1 rows of
# cross-chunk context from the previous block); silu/L2-norm/gating are already fused.


def gdn_mixer(p, x, cfg, ln_scale):
    """GatedDeltaNet mixer forward. x: (B, T, D) f32 residual -> (B, T, D) f32."""
    B, T, D = x.shape
    H = cfg.n_heads
    dk = D // H
    dv = dk * cfg.expand_v
    HK, HV = H * dk, H * dv

    # fused [scale * rms_norm] prologue + single lane-dense projection [q|k|v|gate|b|a]
    y = pallas_matmul(x.reshape(B * T, D), p['in_proj_w'],
                      norm=(D, ln_scale, _F32_EPS), out_dtype=jnp.bfloat16)
    y = y.reshape(B, T, -1)
    off_g = 2 * HK + HV
    off_b = off_g + HV
    qkv = y[..., :off_g]
    gate = y[..., off_g:off_b]
    ba = y[..., off_b:off_b + 2 * H].astype(jnp.float32)

    # short causal depthwise conv (silu + L2 norm + gating fused into the GDN kernel)
    qkv = causal_conv1d(qkv, p['conv_w'])

    o = gated_delta_rule(qkv, ba, p['head_params'],
                         n_heads=H, dk=dk, dv=dv)                     # (B, T, H*dv)

    # fused gated RMSNorm per head, then output projection
    o = gated_rms_norm(o.reshape(B, T, H, dv), gate.reshape(B, T, H, dv),
                       p['o_norm_w'])
    out = pallas_matmul(o.reshape(B * T, HV), p['o_w'], out_dtype=jnp.float32)
    return out[:, :D].reshape(B, T, D)


def mlp_forward(p, x, ln_scale):
    """Squared-ReLU MLP: c_proj(relu(c_fc(scale*rmsnorm(x)))^2); norm+relu^2 fused."""
    B, T, D = x.shape
    h = pallas_matmul(x.reshape(B * T, D), p['fc_w'], act=_relu_sq,
                      norm=(D, ln_scale, _F32_EPS), out_dtype=jnp.bfloat16)
    out = pallas_matmul(h, p['proj_w'], out_dtype=jnp.float32)
    return out[:, :D].reshape(B, T, D)


def block_forward(bp, x, scale, cfg):
    x = x + gdn_mixer(bp['mixer'], x, cfg, scale)
    x = x + mlp_forward(bp['mlp'], x, scale)
    return x


def model_forward(params, idx, cfg):
    """idx: (B, T) int32 -> logits (B, 1, vocab) float32 (targets=None path)."""
    x = params['wte'][idx]                       # embedding gather (glue)
    x = rms_norm(x)
    for i, bp in enumerate(params['blocks']):
        scale = (1.0 / math.sqrt(i + 1)) if cfg.layer_norm_scaling else 1.0
        x = block_forward(bp, x, scale, cfg)
    # final rms_norm fused into the lm_head matmul prologue
    logits = pallas_matmul(x[:, -1, :], params['lm_head_t'],
                           norm=(cfg.d_model, 1.0, _F32_EPS), out_dtype=jnp.float32)
    logits = logits[:, :cfg.vocab_size]
    return logits[:, None, :]
    # TODO(synk): fused linear cross-entropy training path (targets != None) not implemented.


# ----------------------------- init -----------------------------------------
def init_params(key, cfg):
    D, H, V = cfg.d_model, cfg.n_heads, cfg.vocab_size
    dk = D // H
    dv = dk * cfg.expand_v
    HK, HV = H * dk, H * dv
    n_proj = 2 * HK + 2 * HV + 2 * H             # [q | k | v | gate | b | a]
    keys = iter(jax.random.split(key, 4 + 8 * cfg.n_layers))

    def dense(shape, scale=0.02):
        return (scale * jax.random.normal(next(keys), shape)).astype(jnp.float32)

    def prep_w(w):   # one-time: pad to 128-multiples + cast bf16 (no per-call pad/cast)
        r, c = w.shape
        w = jnp.pad(w, ((0, _round_up(r, 128) - r), (0, _round_up(c, 128) - c)))
        return w.astype(jnp.bfloat16)

    params = {
        'wte': dense((V, D)),
        'lm_head_t': prep_w(jnp.zeros((D, V), jnp.float32)),  # zero init, stored (D, V)
        'blocks': [],
    }
    for _ in range(cfg.n_layers):
        blk = {
            'mixer': {
                'in_proj_w': prep_w(dense((D, n_proj))),
                'conv_w': dense((2 * HK + HV, cfg.conv_size), 0.2),
                'head_params': jnp.stack([
                    jnp.log(jnp.linspace(1.0, 8.0, H)),                  # A_log
                    jnp.log(jnp.expm1(jnp.full((H,), 0.5)))]             # dt_bias
                ).astype(jnp.float32),
                'o_norm_w': jnp.ones((dv,), jnp.float32),                # gated-norm weight
                'o_w': prep_w(dense((HV, D))),
            },
            'mlp': {
                'fc_w': prep_w(dense((D, 4 * D))),
                'proj_w': prep_w(dense((4 * D, D))),
            },
        }
        params['blocks'].append(blk)
    return params


# ----------------------------- main ------------------------------------------
if __name__ == "__main__":
    cfg = NanoConfig()
    key = jax.random.PRNGKey(0)
    pkey, ikey = jax.random.split(key)

    params = init_params(pkey, cfg)
    B, T = 2, 8
    idx = jax.random.randint(ikey, (B, T), 0, cfg.vocab_size, dtype=jnp.int32)

    fwd = jax.jit(functools.partial(model_forward, cfg=cfg))
    logits = fwd(params, idx)
    jax.block_until_ready(logits)

    assert logits.shape == (B, 1, cfg.vocab_size)
    assert logits.dtype == jnp.float32
    assert bool(jnp.all(jnp.isfinite(logits)))
    print("KERNEL_OK")
</pallas_src>

<mosaic_0001>
module attributes {stable_mosaic.version = 11 : i64} {
  func.func @_rmsnorm_kernel(%arg0: i32, %arg1: memref<16x32xf32, #tpu.memory_space<vmem>>, %arg2: memref<16x32xf32, #tpu.memory_space<vmem>>) attributes {dimension_semantics = [#tpu.dimension_semantics<parallel>], iteration_bounds = array<i64: 1>, scalar_prefetch = 0 : i64, scratch_operands = 0 : i64, tpu.core_type = #tpu.core_type<tc>, window_params = [{transform_indices = @transform_0, window_bounds = array<i64: 16, 32>}, {transform_indices = @transform_1, window_bounds = array<i64: 16, 32>}]} {
    %c0 = arith.constant 0 : index
    %c0_0 = arith.constant 0 : index
    %0 = vector.load %arg1[%c0, %c0_0] : memref<16x32xf32, #tpu.memory_space<vmem>>, vector<16x32xf32>
    %1 = arith.mulf %0, %0 : vector<16x32xf32>
    %cst = arith.constant dense<0.000000e+00> : vector<16xf32>
    %2 = vector.multi_reduction <add>, %1, %cst [1] : vector<16x32xf32> to vector<16xf32>
    %3 = vector.shape_cast %2 : vector<16xf32> to vector<16x1xf32>
    %cst_1 = arith.constant 3.200000e+01 : f32
    %4 = vector.broadcast %cst_1 : f32 to vector<16x1xf32>
    %5 = arith.divf %3, %4 : vector<16x1xf32>
    %cst_2 = arith.constant 1.1920929E-7 : f32
    %6 = vector.broadcast %cst_2 : f32 to vector<16x1xf32>
    %7 = arith.addf %5, %6 : vector<16x1xf32>
    %8 = math.rsqrt %7 : vector<16x1xf32>
    %9 = vector.broadcast %8 : vector<16x1xf32> to vector<16x32xf32>
    %10 = arith.mulf %0, %9 : vector<16x32xf32>
    %cst_3 = arith.constant 1.000000e+00 : f32
    %11 = vector.broadcast %cst_3 : f32 to vector<16x32xf32>
    %12 = arith.mulf %10, %11 : vector<16x32xf32>
    %c0_4 = arith.constant 0 : index
    %c0_5 = arith.constant 0 : index
    %13 = vector.load %arg2[%c0_4, %c0_5] : memref<16x32xf32, #tpu.memory_space<vmem>>, vector<16x32xf32>
    tpu.vector_store %arg2[%c0_4, %c0_5], %12 {strides = array<i32>} : memref<16x32xf32, #tpu.memory_space<vmem>>, vector<16x32xf32>,
    return
  }
  func.func @transform_0(%arg0: i32) -> (i32, i32) {
    %c0_i32 = arith.constant 0 : i32
    %c0_i32_0 = arith.constant 0 : i32
    return %arg0, %c0_i32 : i32, i32
  }
  func.func @transform_1(%arg0: i32) -> (i32, i32) {
    %c0_i32 = arith.constant 0 : i32
    %c0_i32_0 = arith.constant 0 : i32
    return %arg0, %c0_i32 : i32, i32
  }
}

module attributes {stable_mosaic.version = 11 : i64} {
  func.func @_matmul_kernel(%arg0: i32, %arg1: i32, %arg2: i32, %arg3: memref<16x128xf32, #tpu.memory_space<vmem>>, %arg4: memref<128x256xbf16, #tpu.memory_space<vmem>>, %arg5: memref<16x256xbf16, #tpu.memory_space<vmem>>, %arg6: memref<16x256xf32, #tpu.memory_space<vmem>>) attributes {dimension_semantics = [#tpu.dimension_semantics<parallel>, #tpu.dimension_semantics<parallel>, #tpu.dimension_semantics<arbitrary>], iteration_bounds = array<i64: 1, 1, 1>, scalar_prefetch = 0 : i64, scratch_operands = 1 : i64, tpu.core_type = #tpu.core_type<tc>, window_params = [{transform_indices = @transform_0, window_bounds = array<i64: 16, 128>}, {transform_indices = @transform_1, window_bounds = array<i64: 128, 256>}, {transform_indices = @transform_2, window_bounds = array<i64: 16, 256>}]} {
    %c0_i32 = arith.constant 0 : i32
    %0 = arith.cmpi eq, %arg2, %c0_i32 : i32
    %1 = arith.extui %0 : i1 to i32
    %c0_i32_0 = arith.constant 0 : i32
    %2 = arith.cmpi ne, %1, %c0_i32_0 : i32
    scf.if %2 {
      %cst_14 = arith.constant 0.000000e+00 : f32
      %25 = vector.broadcast %cst_14 : f32 to vector<16x256xf32>
      %c0_15 = arith.constant 0 : index
      %c0_16 = arith.constant 0 : index
      %26 = vector.load %arg6[%c0_15, %c0_16] : memref<16x256xf32, #tpu.memory_space<vmem>>, vector<16x256xf32>
      tpu.vector_store %arg6[%c0_15, %c0_16], %25 {strides = array<i32>} : memref<16x256xf32, #tpu.memory_space<vmem>>, vector<16x256xf32>,
    } else {
    }
    %c0 = arith.constant 0 : index
    %c0_1 = arith.constant 0 : index
    %3 = vector.load %arg3[%c0, %c0_1] : memref<16x128xf32, #tpu.memory_space<vmem>>, vector<16x128xf32>
    %4 = arith.mulf %3, %3 : vector<16x128xf32>
    %cst = arith.constant dense<0.000000e+00> : vector<16xf32>
    %5 = vector.multi_reduction <add>, %4, %cst [1] : vector<16x128xf32> to vector<16xf32>
    %6 = vector.shape_cast %5 : vector<16xf32> to vector<16x1xf32>
    %cst_2 = arith.constant 3.125000e-02 : f32
    %7 = vector.broadcast %cst_2 : f32 to vector<16x1xf32>
    %8 = arith.mulf %6, %7 : vector<16x1xf32>
    %cst_3 = arith.constant 1.1920929E-7 : f32
    %9 = vector.broadcast %cst_3 : f32 to vector<16x1xf32>
    %10 = arith.addf %8, %9 : vector<16x1xf32>
    %11 = math.rsqrt %10 : vector<16x1xf32>
    %12 = vector.broadcast %11 : vector<16x1xf32> to vector<16x128xf32>
    %13 = arith.mulf %3, %12 : vector<16x128xf32>
    %cst_4 = arith.constant 1.000000e+00 : f32
    %14 = vector.broadcast %cst_4 : f32 to vector<16x128xf32>
    %15 = arith.mulf %13, %14 : vector<16x128xf32>
    %16 = arith.truncf %15 : vector<16x128xf32> to vector<16x128xbf16>
    %c0_5 = arith.constant 0 : index
    %c0_6 = arith.constant 0 : index
    %17 = vector.load %arg6[%c0_5, %c0_6] : memref<16x256xf32, #tpu.memory_space<vmem>>, vector<16x256xf32>
    %c0_7 = arith.constant 0 : index
    %c0_8 = arith.constant 0 : index
    %18 = vector.load %arg4[%c0_7, %c0_8] : memref<128x256xbf16, #tpu.memory_space<vmem>>, vector<128x256xbf16>
    %cst_9 = arith.constant dense<0.000000e+00> : vector<16x256xf32>
    %19 = tpu.matmul %16, %18, %cst_9 {dimension_numbers = #tpu.dot_dimension_numbers<[1], [0], [0], [1], [0, 0, 1, 1], [], []>} : vector<16x128xbf16>, vector<128x256xbf16>, vector<16x256xf32> -> vector<16x256xf32>
    %20 = arith.addf %17, %19 : vector<16x256xf32>
    %c0_10 = arith.constant 0 : index
    %c0_11 = arith.constant 0 : index
    %21 = vector.load %arg6[%c0_10, %c0_11] : memref<16x256xf32, #tpu.memory_space<vmem>>, vector<16x256xf32>
    tpu.vector_store %arg6[%c0_10, %c0_11], %20 {strides = array<i32>} : memref<16x256xf32, #tpu.memory_space<vmem>>, vector<16x256xf32>,
    %c0_i32_12 = arith.constant 0 : i32
    %22 = arith.cmpi eq, %arg2, %c0_i32_12 : i32
    %23 = arith.extui %22 : i1 to i32
    %c0_i32_13 = arith.constant 0 : i32
    %24 = arith.cmpi ne, %23, %c0_i32_13 : i32
    scf.if %24 {
      %c0_14 = arith.constant 0 : index
      %c0_15 = arith.constant 0 : index
      %25 = vector.load %arg6[%c0_14, %c0_15] : memref<16x256xf32, #tpu.memory_space<vmem>>, vector<16x256xf32>
      %26 = arith.truncf %25 : vector<16x256xf32> to vector<16x256xbf16>
      %c0_16 = arith.constant 0 : index
      %c0_17 = arith.constant 0 : index
      %27 = vector.load %arg5[%c0_16, %c0_17] : memref<16x256xbf16, #tpu.memory_space<vmem>>, vector<16x256xbf16>
      tpu.vector_store %arg5[%c0_16, %c0_17], %26 {strides = array<i32>} : memref<16x256xbf16, #tpu.memory_space<vmem>>, vector<16x256xbf16>,
    } else {
    }
    return
  }
  func.func @transform_0(%arg0: i32, %arg1: i32, %arg2: i32) -> (i32, i32) {
    %c0_i32 = arith.constant 0 : i32
    return %arg0, %arg2 : i32, i32
  }
  func.func @transform_1(%arg0: i32, %arg1: i32, %arg2: i32) -> (i32, i32) {
    %c0_i32 = arith.constant 0 : i32
    return %arg2, %arg1 : i32, i32
  }
  func.func @transform_2(%arg0: i32, %arg1: i32, %arg2: i32) -> (i32, i32) {
    %c0_i32 = arith.constant 0 : i32
    return %arg0, %arg1 : i32, i32
  }
}

module attributes {stable_mosaic.version = 11 : i64} {
  func.func @_gdn_kernel(%arg0: i32, %arg1: i32, %arg2: memref<1x8x96xbf16, #tpu.memory_space<vmem>>, %arg3: memref<1x8x4xf32, #tpu.memory_space<vmem>>, %arg4: memref<2x2xf32, #tpu.memory_space<vmem>>, %arg5: memref<1x8x32xf32, #tpu.memory_space<vmem>>, %arg6: memref<2x16x16xf32, #tpu.memory_space<vmem>>) attributes {dimension_semantics = [#tpu.dimension_semantics<parallel>, #tpu.dimension_semantics<arbitrary>], iteration_bounds = array<i64: 2, 1>, scalar_prefetch = 0 : i64, scratch_operands = 1 : i64, tpu.core_type = #tpu.core_type<tc>, window_params = [{transform_indices = @transform_0, window_bounds = array<i64: 1, 8, 96>}, {transform_indices = @transform_1, window_bounds = array<i64: 1, 8, 4>}, {pipeline_mode = #tpu.pipeline_mode<synchronous>, transform_indices = @transform_2, window_bounds = array<i64: 2, 2>}, {transform_indices = @transform_3, window_bounds = array<i64: 1, 8, 32>}]} {
    %c0_i32 = arith.constant 0 : i32
    %0 = arith.cmpi eq, %arg1, %c0_i32 : i32
    %1 = arith.extui %0 : i1 to i32
    %c0_i32_0 = arith.constant 0 : i32
    %2 = arith.cmpi ne, %1, %c0_i32_0 : i32
    scf.if %2 {
      %cst_105 = arith.constant 0.000000e+00 : f32
      %275 = vector.broadcast %cst_105 : f32 to vector<2x16x16xf32>
      %c0_106 = arith.constant 0 : index
      %c0_107 = arith.constant 0 : index
      %c0_108 = arith.constant 0 : index
      %276 = vector.load %arg6[%c0_106, %c0_107, %c0_108] : memref<2x16x16xf32, #tpu.memory_space<vmem>>, vector<2x16x16xf32>
      tpu.vector_store %arg6[%c0_106, %c0_107, %c0_108], %275 {strides = array<i32>} : memref<2x16x16xf32, #tpu.memory_space<vmem>>, vector<2x16x16xf32>,
    } else {
    }
    %3 = tpu.iota {dimensions = array<i32: 0>} : vector<8x8xi32>
    %4 = tpu.iota {dimensions = array<i32: 1>} : vector<8x8xi32>
    %5 = arith.cmpi sgt, %3, %4 : vector<8x8xi32>
    %6 = arith.cmpi sge, %3, %4 : vector<8x8xi32>
    %7 = arith.cmpi eq, %3, %4 : vector<8x8xi32>
    %8 = arith.extui %7 : vector<8x8xi1> to vector<8x8xi32>
    %9 = arith.sitofp %8 : vector<8x8xi32> to vector<8x8xf32>
    %10 = arith.extui %6 : vector<8x8xi1> to vector<8x8xi32>
    %11 = arith.sitofp %10 : vector<8x8xi32> to vector<8x8xf32>
    %cst = arith.constant 1.000000e+00 : f32
    %12 = vector.broadcast %cst : f32 to vector<8x1xf32>
    %c0 = arith.constant 0 : index
    %c0_1 = arith.constant 0 : index
    %c0_2 = arith.constant 0 : index
    %13 = vector.load %arg2[%c0, %c0_1, %c0_2] : memref<1x8x96xbf16, #tpu.memory_space<vmem>>, vector<1x8x16xbf16>
    %14 = vector.shape_cast %13 : vector<1x8x16xbf16> to vector<8x16xbf16>
    %15 = arith.extf %14 : vector<8x16xbf16> to vector<8x16xf32>
    %c0_3 = arith.constant 0 : index
    %c0_4 = arith.constant 0 : index
    %c32 = arith.constant 32 : index
    %16 = vector.load %arg2[%c0_3, %c0_4, %c32] : memref<1x8x96xbf16, #tpu.memory_space<vmem>>, vector<1x8x16xbf16>
    %17 = vector.shape_cast %16 : vector<1x8x16xbf16> to vector<8x16xbf16>
    %18 = arith.extf %17 : vector<8x16xbf16> to vector<8x16xf32>
    %c0_5 = arith.constant 0 : index
    %c0_6 = arith.constant 0 : index
    %c64 = arith.constant 64 : index
    %19 = vector.load %arg2[%c0_5, %c0_6, %c64] : memref<1x8x96xbf16, #tpu.memory_space<vmem>>, vector<1x8x16xbf16>
    %20 = vector.shape_cast %19 : vector<1x8x16xbf16> to vector<8x16xbf16>
    %21 = arith.extf %20 : vector<8x16xbf16> to vector<8x16xf32>
    %c0_7 = arith.constant 0 : index
    %c0_8 = arith.constant 0 : index
    %c0_9 = arith.constant 0 : index
    %22 = vector.load %arg3[%c0_7, %c0_8, %c0_9] : memref<1x8x4xf32, #tpu.memory_space<vmem>>, vector<1x8x1xf32>
    %23 = vector.shape_cast %22 : vector<1x8x1xf32> to vector<8x1xf32>
    %c0_10 = arith.constant 0 : index
    %c0_11 = arith.constant 0 : index
    %c2 = arith.constant 2 : index
    %24 = vector.load %arg3[%c0_10, %c0_11, %c2] : memref<1x8x4xf32, #tpu.memory_space<vmem>>, vector<1x8x1xf32>
    %25 = vector.shape_cast %24 : vector<1x8x1xf32> to vector<8x1xf32>
    %26 = arith.negf %15 : vector<8x16xf32>
    %27 = math.exp %26 : vector<8x16xf32>
    %cst_12 = arith.constant 1.000000e+00 : f32
    %28 = vector.broadcast %cst_12 : f32 to vector<8x16xf32>
    %29 = arith.addf %28, %27 : vector<8x16xf32>
    %30 = arith.divf %28, %29 : vector<8x16xf32>
    %31 = arith.mulf %15, %30 : vector<8x16xf32>
    %32 = arith.negf %18 : vector<8x16xf32>
    %33 = math.exp %32 : vector<8x16xf32>
    %cst_13 = arith.constant 1.000000e+00 : f32
    %34 = vector.broadcast %cst_13 : f32 to vector<8x16xf32>
    %35 = arith.addf %34, %33 : vector<8x16xf32>
    %36 = arith.divf %34, %35 : vector<8x16xf32>
    %37 = arith.mulf %18, %36 : vector<8x16xf32>
    %38 = arith.negf %21 : vector<8x16xf32>
    %39 = math.exp %38 : vector<8x16xf32>
    %cst_14 = arith.constant 1.000000e+00 : f32
    %40 = vector.broadcast %cst_14 : f32 to vector<8x16xf32>
    %41 = arith.addf %40, %39 : vector<8x16xf32>
    %42 = arith.divf %40, %41 : vector<8x16xf32>
    %43 = arith.mulf %21, %42 : vector<8x16xf32>
    %44 = arith.mulf %31, %31 : vector<8x16xf32>
    %cst_15 = arith.constant dense<0.000000e+00> : vector<8xf32>
    %45 = vector.multi_reduction <add>, %44, %cst_15 [1] : vector<8x16xf32> to vector<8xf32>
    %46 = vector.shape_cast %45 : vector<8xf32> to vector<8x1xf32>
    %cst_16 = arith.constant 9.99999997E-7 : f32
    %47 = vector.broadcast %cst_16 : f32 to vector<8x1xf32>
    %48 = arith.addf %46, %47 : vector<8x1xf32>
    %49 = math.rsqrt %48 : vector<8x1xf32>
    %50 = vector.broadcast %49 : vector<8x1xf32> to vector<8x16xf32>
    %51 = arith.mulf %31, %50 : vector<8x16xf32>
    %cst_17 = arith.constant 2.500000e-01 : f32
    %52 = vector.broadcast %cst_17 : f32 to vector<8x16xf32>
    %53 = arith.mulf %51, %52 : vector<8x16xf32>
    %54 = arith.mulf %37, %37 : vector<8x16xf32>
    %cst_18 = arith.constant dense<0.000000e+00> : vector<8xf32>
    %55 = vector.multi_reduction <add>, %54, %cst_18 [1] : vector<8x16xf32> to vector<8xf32>
    %56 = vector.shape_cast %55 : vector<8xf32> to vector<8x1xf32>
    %cst_19 = arith.constant 9.99999997E-7 : f32
    %57 = vector.broadcast %cst_19 : f32 to vector<8x1xf32>
    %58 = arith.addf %56, %57 : vector<8x1xf32>
    %59 = math.rsqrt %58 : vector<8x1xf32>
    %60 = vector.broadcast %59 : vector<8x1xf32> to vector<8x16xf32>
    %61 = arith.mulf %37, %60 : vector<8x16xf32>
    %c0_20 = arith.constant 0 : index
    %c0_21 = arith.constant 0 : index
    %62 = vector.load %arg4[%c0_20, %c0_21] : memref<2x2xf32, #tpu.memory_space<vmem>>, vector<1x1xf32>
    %63 = math.exp %62 : vector<1x1xf32>
    %c1 = arith.constant 1 : index
    %c0_22 = arith.constant 0 : index
    %64 = vector.load %arg4[%c1, %c0_22] : memref<2x2xf32, #tpu.memory_space<vmem>>, vector<1x1xf32>
    %65 = arith.negf %23 : vector<8x1xf32>
    %66 = math.exp %65 : vector<8x1xf32>
    %cst_23 = arith.constant 1.000000e+00 : f32
    %67 = vector.broadcast %cst_23 : f32 to vector<8x1xf32>
    %68 = arith.addf %67, %66 : vector<8x1xf32>
    %69 = arith.divf %67, %68 : vector<8x1xf32>
    %cst_24 = arith.constant 0.000000e+00 : f32
    %70 = vector.broadcast %cst_24 : f32 to vector<1x1xf32>
    %71 = arith.subf %70, %63 : vector<1x1xf32>
    %72 = vector.broadcast %64 : vector<1x1xf32> to vector<8x1xf32>
    %73 = arith.addf %25, %72 : vector<8x1xf32>
    %cst_25 = arith.constant 2.000000e+01 : f32
    %74 = vector.broadcast %cst_25 : f32 to vector<8x1xf32>
    %75 = arith.cmpf ogt, %73, %74 : vector<8x1xf32>
    %cst_26 = arith.constant 2.000000e+01 : f32
    %76 = vector.broadcast %cst_26 : f32 to vector<8x1xf32>
    %77 = arith.minimumf %73, %76 : vector<8x1xf32>
    %78 = math.exp %77 : vector<8x1xf32>
    %cst_27 = arith.constant 1.000000e+00 : f32
    %79 = vector.broadcast %cst_27 : f32 to vector<8x1xf32>
    %80 = arith.addf %79, %78 : vector<8x1xf32>
    %81 = math.log %80 : vector<8x1xf32>
    %82 = arith.select %75, %73, %81 : vector<8x1xi1>, vector<8x1xf32>
    %83 = vector.broadcast %71 : vector<1x1xf32> to vector<8x1xf32>
    %84 = arith.mulf %83, %82 : vector<8x1xf32>
    %cst_28 = arith.constant dense<0.000000e+00> : vector<8x1xf32>
    %85 = tpu.matmul %11, %84, %cst_28 {dimension_numbers = #tpu.dot_dimension_numbers<[1], [0], [0], [1], [0, 0, 1, 1], [], []>} : vector<8x8xf32>, vector<8x1xf32>, vector<8x1xf32> -> vector<8x1xf32>
    %cst_29 = arith.constant dense<0.000000e+00> : vector<1xf32>
    %86 = vector.multi_reduction <add>, %84, %cst_29 [0] : vector<8x1xf32> to vector<1xf32>
    %87 = vector.shape_cast %86 : vector<1xf32> to vector<1x1xf32>
    %cst_30 = arith.constant dense<0.000000e+00> : vector<8x8xf32>
    %88 = tpu.matmul %12, %85, %cst_30 {dimension_numbers = #tpu.dot_dimension_numbers<[1], [1], [0], [0], [0, 0, 1, 0], [], []>} : vector<8x1xf32>, vector<8x1xf32>, vector<8x8xf32> -> vector<8x8xf32>
    %89 = vector.broadcast %85 : vector<8x1xf32> to vector<8x8xf32>
    %90 = arith.subf %89, %88 : vector<8x8xf32>
    %cst_31 = arith.constant -1.000000e+30 : f32
    %91 = vector.broadcast %cst_31 : f32 to vector<8x8xf32>
    %92 = arith.select %6, %90, %91 : vector<8x8xi1>, vector<8x8xf32>
    %93 = math.exp %92 : vector<8x8xf32>
    %cst_32 = arith.constant -1.000000e+30 : f32
    %94 = vector.broadcast %cst_32 : f32 to vector<8x8xf32>
    %95 = arith.select %5, %90, %94 : vector<8x8xi1>, vector<8x8xf32>
    %96 = math.exp %95 : vector<8x8xf32>
    %c0_33 = arith.constant 0 : index
    %c0_34 = arith.constant 0 : index
    %c0_35 = arith.constant 0 : index
    %97 = vector.load %arg6[%c0_33, %c0_34, %c0_35] : memref<2x16x16xf32, #tpu.memory_space<vmem>>, vector<1x16x16xf32>
    %98 = vector.shape_cast %97 : vector<1x16x16xf32> to vector<16x16xf32>
    %99 = vector.broadcast %69 : vector<8x1xf32> to vector<8x8xf32>
    %100 = arith.mulf %99, %96 : vector<8x8xf32>
    %cst_36 = arith.constant dense<0.000000e+00> : vector<8x8xf32>
    %101 = tpu.matmul %61, %61, %cst_36 {dimension_numbers = #tpu.dot_dimension_numbers<[1], [1], [0], [0], [0, 0, 1, 0], [], []>} : vector<8x16xf32>, vector<8x16xf32>, vector<8x8xf32> -> vector<8x8xf32>
    %102 = arith.mulf %100, %101 : vector<8x8xf32>
    %cst_37 = arith.constant 0.000000e+00 : f32
    %103 = vector.broadcast %cst_37 : f32 to vector<8x8xf32>
    %104 = arith.subf %103, %102 : vector<8x8xf32>
    %105 = arith.addf %9, %104 : vector<8x8xf32>
    %cst_38 = arith.constant dense<0.000000e+00> : vector<8x8xf32>
    %106 = tpu.matmul %104, %104, %cst_38 {dimension_numbers = #tpu.dot_dimension_numbers<[1], [0], [0], [1], [0, 0, 1, 1], [], []>} : vector<8x8xf32>, vector<8x8xf32>, vector<8x8xf32> -> vector<8x8xf32>
    %cst_39 = arith.constant dense<0.000000e+00> : vector<8x8xf32>
    %107 = tpu.matmul %105, %106, %cst_39 {dimension_numbers = #tpu.dot_dimension_numbers<[1], [0], [0], [1], [0, 0, 1, 1], [], []>} : vector<8x8xf32>, vector<8x8xf32>, vector<8x8xf32> -> vector<8x8xf32>
    %108 = arith.addf %105, %107 : vector<8x8xf32>
    %cst_40 = arith.constant dense<0.000000e+00> : vector<8x8xf32>
    %109 = tpu.matmul %106, %106, %cst_40 {dimension_numbers = #tpu.dot_dimension_numbers<[1], [0], [0], [1], [0, 0, 1, 1], [], []>} : vector<8x8xf32>, vector<8x8xf32>, vector<8x8xf32> -> vector<8x8xf32>
    %cst_41 = arith.constant dense<0.000000e+00> : vector<8x8xf32>
    %110 = tpu.matmul %108, %109, %cst_41 {dimension_numbers = #tpu.dot_dimension_numbers<[1], [0], [0], [1], [0, 0, 1, 1], [], []>} : vector<8x8xf32>, vector<8x8xf32>, vector<8x8xf32> -> vector<8x8xf32>
    %111 = arith.addf %108, %110 : vector<8x8xf32>
    %112 = vector.broadcast %69 : vector<8x1xf32> to vector<8x16xf32>
    %113 = arith.mulf %112, %43 : vector<8x16xf32>
    %114 = math.exp %85 : vector<8x1xf32>
    %115 = arith.mulf %69, %114 : vector<8x1xf32>
    %cst_42 = arith.constant dense<0.000000e+00> : vector<8x16xf32>
    %116 = tpu.matmul %61, %98, %cst_42 {dimension_numbers = #tpu.dot_dimension_numbers<[1], [0], [0], [1], [0, 0, 1, 1], [], []>} : vector<8x16xf32>, vector<16x16xf32>, vector<8x16xf32> -> vector<8x16xf32>
    %117 = vector.broadcast %115 : vector<8x1xf32> to vector<8x16xf32>
    %118 = arith.mulf %117, %116 : vector<8x16xf32>
    %119 = arith.subf %113, %118 : vector<8x16xf32>
    %cst_43 = arith.constant dense<0.000000e+00> : vector<8x16xf32>
    %120 = tpu.matmul %111, %119, %cst_43 {dimension_numbers = #tpu.dot_dimension_numbers<[1], [0], [0], [1], [0, 0, 1, 1], [], []>} : vector<8x8xf32>, vector<8x16xf32>, vector<8x16xf32> -> vector<8x16xf32>
    %121 = math.exp %85 : vector<8x1xf32>
    %cst_44 = arith.constant dense<0.000000e+00> : vector<8x16xf32>
    %122 = tpu.matmul %53, %98, %cst_44 {dimension_numbers = #tpu.dot_dimension_numbers<[1], [0], [0], [1], [0, 0, 1, 1], [], []>} : vector<8x16xf32>, vector<16x16xf32>, vector<8x16xf32> -> vector<8x16xf32>
    %123 = vector.broadcast %121 : vector<8x1xf32> to vector<8x16xf32>
    %124 = arith.mulf %123, %122 : vector<8x16xf32>
    %cst_45 = arith.constant dense<0.000000e+00> : vector<8x8xf32>
    %125 = tpu.matmul %53, %61, %cst_45 {dimension_numbers = #tpu.dot_dimension_numbers<[1], [1], [0], [0], [0, 0, 1, 0], [], []>} : vector<8x16xf32>, vector<8x16xf32>, vector<8x8xf32> -> vector<8x8xf32>
    %126 = arith.mulf %93, %125 : vector<8x8xf32>
    %cst_46 = arith.constant dense<0.000000e+00> : vector<8x16xf32>
    %127 = tpu.matmul %126, %120, %cst_46 {dimension_numbers = #tpu.dot_dimension_numbers<[1], [0], [0], [1], [0, 0, 1, 1], [], []>} : vector<8x8xf32>, vector<8x16xf32>, vector<8x16xf32> -> vector<8x16xf32>
    %128 = arith.addf %124, %127 : vector<8x16xf32>
    %129 = vector.broadcast %87 : vector<1x1xf32> to vector<8x1xf32>
    %130 = arith.subf %129, %85 : vector<8x1xf32>
    %131 = math.exp %130 : vector<8x1xf32>
    %132 = vector.broadcast %131 : vector<8x1xf32> to vector<8x16xf32>
    %133 = arith.mulf %132, %61 : vector<8x16xf32>
    %134 = math.exp %87 : vector<1x1xf32>
    %135 = vector.broadcast %134 : vector<1x1xf32> to vector<16x16xf32>
    %136 = arith.mulf %135, %98 : vector<16x16xf32>
    %cst_47 = arith.constant dense<0.000000e+00> : vector<16x16xf32>
    %137 = tpu.matmul %133, %120, %cst_47 {dimension_numbers = #tpu.dot_dimension_numbers<[0], [0], [1], [1], [0, 1, 1, 1], [], []>} : vector<8x16xf32>, vector<8x16xf32>, vector<16x16xf32> -> vector<16x16xf32>
    %138 = arith.addf %136, %137 : vector<16x16xf32>
    %c0_48 = arith.constant 0 : index
    %c0_49 = arith.constant 0 : index
    %c0_50 = arith.constant 0 : index
    %139 = vector.load %arg6[%c0_48, %c0_49, %c0_50] : memref<2x16x16xf32, #tpu.memory_space<vmem>>, vector<1x16x16xf32>
    %140 = vector.shape_cast %139 : vector<1x16x16xf32> to vector<16x16xf32>
    %141 = vector.shape_cast %138 : vector<16x16xf32> to vector<1x16x16xf32>
    tpu.vector_store %arg6[%c0_48, %c0_49, %c0_50], %141 {strides = array<i32>} : memref<2x16x16xf32, #tpu.memory_space<vmem>>, vector<1x16x16xf32>,
    %c0_51 = arith.constant 0 : index
    %c0_52 = arith.constant 0 : index
    %c16 = arith.constant 16 : index
    %142 = vector.load %arg2[%c0_51, %c0_52, %c16] : memref<1x8x96xbf16, #tpu.memory_space<vmem>>, vector<1x8x16xbf16>
    %143 = vector.shape_cast %142 : vector<1x8x16xbf16> to vector<8x16xbf16>
    %144 = arith.extf %143 : vector<8x16xbf16> to vector<8x16xf32>
    %c0_53 = arith.constant 0 : index
    %c0_54 = arith.constant 0 : index
    %c48 = arith.constant 48 : index
    %145 = vector.load %arg2[%c0_53, %c0_54, %c48] : memref<1x8x96xbf16, #tpu.memory_space<vmem>>, vector<1x8x16xbf16>
    %146 = vector.shape_cast %145 : vector<1x8x16xbf16> to vector<8x16xbf16>
    %147 = arith.extf %146 : vector<8x16xbf16> to vector<8x16xf32>
    %c0_55 = arith.constant 0 : index
    %c0_56 = arith.constant 0 : index
    %c80 = arith.constant 80 : index
    %148 = vector.load %arg2[%c0_55, %c0_56, %c80] : memref<1x8x96xbf16, #tpu.memory_space<vmem>>, vector<1x8x16xbf16>
    %149 = vector.shape_cast %148 : vector<1x8x16xbf16> to vector<8x16xbf16>
    %150 = arith.extf %149 : vector<8x16xbf16> to vector<8x16xf32>
    %c0_57 = arith.constant 0 : index
    %c0_58 = arith.constant 0 : index
    %c1_59 = arith.constant 1 : index
    %151 = vector.load %arg3[%c0_57, %c0_58, %c1_59] : memref<1x8x4xf32, #tpu.memory_space<vmem>>, vector<1x8x1xf32>
    %152 = vector.shape_cast %151 : vector<1x8x1xf32> to vector<8x1xf32>
    %c0_60 = arith.constant 0 : index
    %c0_61 = arith.constant 0 : index
    %c3 = arith.constant 3 : index
    %153 = vector.load %arg3[%c0_60, %c0_61, %c3] : memref<1x8x4xf32, #tpu.memory_space<vmem>>, vector<1x8x1xf32>
    %154 = vector.shape_cast %153 : vector<1x8x1xf32> to vector<8x1xf32>
    %155 = arith.negf %144 : vector<8x16xf32>
    %156 = math.exp %155 : vector<8x16xf32>
    %cst_62 = arith.constant 1.000000e+00 : f32
    %157 = vector.broadcast %cst_62 : f32 to vector<8x16xf32>
    %158 = arith.addf %157, %156 : vector<8x16xf32>
    %159 = arith.divf %157, %158 : vector<8x16xf32>
    %160 = arith.mulf %144, %159 : vector<8x16xf32>
    %161 = arith.negf %147 : vector<8x16xf32>
    %162 = math.exp %161 : vector<8x16xf32>
    %cst_63 = arith.constant 1.000000e+00 : f32
    %163 = vector.broadcast %cst_63 : f32 to vector<8x16xf32>
    %164 = arith.addf %163, %162 : vector<8x16xf32>
    %165 = arith.divf %163, %164 : vector<8x16xf32>
    %166 = arith.mulf %147, %165 : vector<8x16xf32>
    %167 = arith.negf %150 : vector<8x16xf32>
    %168 = math.exp %167 : vector<8x16xf32>
    %cst_64 = arith.constant 1.000000e+00 : f32
    %169 = vector.broadcast %cst_64 : f32 to vector<8x16xf32>
    %170 = arith.addf %169, %168 : vector<8x16xf32>
    %171 = arith.divf %169, %170 : vector<8x16xf32>
    %172 = arith.mulf %150, %171 : vector<8x16xf32>
    %173 = arith.mulf %160, %160 : vector<8x16xf32>
    %cst_65 = arith.constant dense<0.000000e+00> : vector<8xf32>
    %174 = vector.multi_reduction <add>, %173, %cst_65 [1] : vector<8x16xf32> to vector<8xf32>
    %175 = vector.shape_cast %174 : vector<8xf32> to vector<8x1xf32>
    %cst_66 = arith.constant 9.99999997E-7 : f32
    %176 = vector.broadcast %cst_66 : f32 to vector<8x1xf32>
    %177 = arith.addf %175, %176 : vector<8x1xf32>
    %178 = math.rsqrt %177 : vector<8x1xf32>
    %179 = vector.broadcast %178 : vector<8x1xf32> to vector<8x16xf32>
    %180 = arith.mulf %160, %179 : vector<8x16xf32>
    %cst_67 = arith.constant 2.500000e-01 : f32
    %181 = vector.broadcast %cst_67 : f32 to vector<8x16xf32>
    %182 = arith.mulf %180, %181 : vector<8x16xf32>
    %183 = arith.mulf %166, %166 : vector<8x16xf32>
    %cst_68 = arith.constant dense<0.000000e+00> : vector<8xf32>
    %184 = vector.multi_reduction <add>, %183, %cst_68 [1] : vector<8x16xf32> to vector<8xf32>
    %185 = vector.shape_cast %184 : vector<8xf32> to vector<8x1xf32>
    %cst_69 = arith.constant 9.99999997E-7 : f32
    %186 = vector.broadcast %cst_69 : f32 to vector<8x1xf32>
    %187 = arith.addf %185, %186 : vector<8x1xf32>
    %188 = math.rsqrt %187 : vector<8x1xf32>
    %189 = vector.broadcast %188 : vector<8x1xf32> to vector<8x16xf32>
    %190 = arith.mulf %166, %189 : vector<8x16xf32>
    %c0_70 = arith.constant 0 : index
    %c1_71 = arith.constant 1 : index
    %191 = vector.load %arg4[%c0_70, %c1_71] : memref<2x2xf32, #tpu.memory_space<vmem>>, vector<1x1xf32>
    %192 = math.exp %191 : vector<1x1xf32>
    %c1_72 = arith.constant 1 : index
    %c1_73 = arith.constant 1 : index
    %193 = vector.load %arg4[%c1_72, %c1_73] : memref<2x2xf32, #tpu.memory_space<vmem>>, vector<1x1xf32>
    %194 = arith.negf %152 : vector<8x1xf32>
    %195 = math.exp %194 : vector<8x1xf32>
    %cst_74 = arith.constant 1.000000e+00 : f32
    %196 = vector.broadcast %cst_74 : f32 to vector<8x1xf32>
    %197 = arith.addf %196, %195 : vector<8x1xf32>
    %198 = arith.divf %196, %197 : vector<8x1xf32>
    %cst_75 = arith.constant 0.000000e+00 : f32
    %199 = vector.broadcast %cst_75 : f32 to vector<1x1xf32>
    %200 = arith.subf %199, %192 : vector<1x1xf32>
    %201 = vector.broadcast %193 : vector<1x1xf32> to vector<8x1xf32>
    %202 = arith.addf %154, %201 : vector<8x1xf32>
    %cst_76 = arith.constant 2.000000e+01 : f32
    %203 = vector.broadcast %cst_76 : f32 to vector<8x1xf32>
    %204 = arith.cmpf ogt, %202, %203 : vector<8x1xf32>
    %cst_77 = arith.constant 2.000000e+01 : f32
    %205 = vector.broadcast %cst_77 : f32 to vector<8x1xf32>
    %206 = arith.minimumf %202, %205 : vector<8x1xf32>
    %207 = math.exp %206 : vector<8x1xf32>
    %cst_78 = arith.constant 1.000000e+00 : f32
    %208 = vector.broadcast %cst_78 : f32 to vector<8x1xf32>
    %209 = arith.addf %208, %207 : vector<8x1xf32>
    %210 = math.log %209 : vector<8x1xf32>
    %211 = arith.select %204, %202, %210 : vector<8x1xi1>, vector<8x1xf32>
    %212 = vector.broadcast %200 : vector<1x1xf32> to vector<8x1xf32>
    %213 = arith.mulf %212, %211 : vector<8x1xf32>
    %cst_79 = arith.constant dense<0.000000e+00> : vector<8x1xf32>
    %214 = tpu.matmul %11, %213, %cst_79 {dimension_numbers = #tpu.dot_dimension_numbers<[1], [0], [0], [1], [0, 0, 1, 1], [], []>} : vector<8x8xf32>, vector<8x1xf32>, vector<8x1xf32> -> vector<8x1xf32>
    %cst_80 = arith.constant dense<0.000000e+00> : vector<1xf32>
    %215 = vector.multi_reduction <add>, %213, %cst_80 [0] : vector<8x1xf32> to vector<1xf32>
    %216 = vector.shape_cast %215 : vector<1xf32> to vector<1x1xf32>
    %cst_81 = arith.constant dense<0.000000e+00> : vector<8x8xf32>
    %217 = tpu.matmul %12, %214, %cst_81 {dimension_numbers = #tpu.dot_dimension_numbers<[1], [1], [0], [0], [0, 0, 1, 0], [], []>} : vector<8x1xf32>, vector<8x1xf32>, vector<8x8xf32> -> vector<8x8xf32>
    %218 = vector.broadcast %214 : vector<8x1xf32> to vector<8x8xf32>
    %219 = arith.subf %218, %217 : vector<8x8xf32>
    %cst_82 = arith.constant -1.000000e+30 : f32
    %220 = vector.broadcast %cst_82 : f32 to vector<8x8xf32>
    %221 = arith.select %6, %219, %220 : vector<8x8xi1>, vector<8x8xf32>
    %222 = math.exp %221 : vector<8x8xf32>
    %cst_83 = arith.constant -1.000000e+30 : f32
    %223 = vector.broadcast %cst_83 : f32 to vector<8x8xf32>
    %224 = arith.select %5, %219, %223 : vector<8x8xi1>, vector<8x8xf32>
    %225 = math.exp %224 : vector<8x8xf32>
    %c1_84 = arith.constant 1 : index
    %c0_85 = arith.constant 0 : index
    %c0_86 = arith.constant 0 : index
    %226 = vector.load %arg6[%c1_84, %c0_85, %c0_86] : memref<2x16x16xf32, #tpu.memory_space<vmem>>, vector<1x16x16xf32>
    %227 = vector.shape_cast %226 : vector<1x16x16xf32> to vector<16x16xf32>
    %228 = vector.broadcast %198 : vector<8x1xf32> to vector<8x8xf32>
    %229 = arith.mulf %228, %225 : vector<8x8xf32>
    %cst_87 = arith.constant dense<0.000000e+00> : vector<8x8xf32>
    %230 = tpu.matmul %190, %190, %cst_87 {dimension_numbers = #tpu.dot_dimension_numbers<[1], [1], [0], [0], [0, 0, 1, 0], [], []>} : vector<8x16xf32>, vector<8x16xf32>, vector<8x8xf32> -> vector<8x8xf32>
    %231 = arith.mulf %229, %230 : vector<8x8xf32>
    %cst_88 = arith.constant 0.000000e+00 : f32
    %232 = vector.broadcast %cst_88 : f32 to vector<8x8xf32>
    %233 = arith.subf %232, %231 : vector<8x8xf32>
    %234 = arith.addf %9, %233 : vector<8x8xf32>
    %cst_89 = arith.constant dense<0.000000e+00> : vector<8x8xf32>
    %235 = tpu.matmul %233, %233, %cst_89 {dimension_numbers = #tpu.dot_dimension_numbers<[1], [0], [0], [1], [0, 0, 1, 1], [], []>} : vector<8x8xf32>, vector<8x8xf32>, vector<8x8xf32> -> vector<8x8xf32>
    %cst_90 = arith.constant dense<0.000000e+00> : vector<8x8xf32>
    %236 = tpu.matmul %234, %235, %cst_90 {dimension_numbers = #tpu.dot_dimension_numbers<[1], [0], [0], [1], [0, 0, 1, 1], [], []>} : vector<8x8xf32>, vector<8x8xf32>, vector<8x8xf32> -> vector<8x8xf32>
    %237 = arith.addf %234, %236 : vector<8x8xf32>
    %cst_91 = arith.constant dense<0.000000e+00> : vector<8x8xf32>
    %238 = tpu.matmul %235, %235, %cst_91 {dimension_numbers = #tpu.dot_dimension_numbers<[1], [0], [0], [1], [0, 0, 1, 1], [], []>} : vector<8x8xf32>, vector<8x8xf32>, vector<8x8xf32> -> vector<8x8xf32>
    %cst_92 = arith.constant dense<0.000000e+00> : vector<8x8xf32>
    %239 = tpu.matmul %237, %238, %cst_92 {dimension_numbers = #tpu.dot_dimension_numbers<[1], [0], [0], [1], [0, 0, 1, 1], [], []>} : vector<8x8xf32>, vector<8x8xf32>, vector<8x8xf32> -> vector<8x8xf32>
    %240 = arith.addf %237, %239 : vector<8x8xf32>
    %241 = vector.broadcast %198 : vector<8x1xf32> to vector<8x16xf32>
    %242 = arith.mulf %241, %172 : vector<8x16xf32>
    %243 = math.exp %214 : vector<8x1xf32>
    %244 = arith.mulf %198, %243 : vector<8x1xf32>
    %cst_93 = arith.constant dense<0.000000e+00> : vector<8x16xf32>
    %245 = tpu.matmul %190, %227, %cst_93 {dimension_numbers = #tpu.dot_dimension_numbers<[1], [0], [0], [1], [0, 0, 1, 1], [], []>} : vector<8x16xf32>, vector<16x16xf32>, vector<8x16xf32> -> vector<8x16xf32>
    %246 = vector.broadcast %244 : vector<8x1xf32> to vector<8x16xf32>
    %247 = arith.mulf %246, %245 : vector<8x16xf32>
    %248 = arith.subf %242, %247 : vector<8x16xf32>
    %cst_94 = arith.constant dense<0.000000e+00> : vector<8x16xf32>
    %249 = tpu.matmul %240, %248, %cst_94 {dimension_numbers = #tpu.dot_dimension_numbers<[1], [0], [0], [1], [0, 0, 1, 1], [], []>} : vector<8x8xf32>, vector<8x16xf32>, vector<8x16xf32> -> vector<8x16xf32>
    %250 = math.exp %214 : vector<8x1xf32>
    %cst_95 = arith.constant dense<0.000000e+00> : vector<8x16xf32>
    %251 = tpu.matmul %182, %227, %cst_95 {dimension_numbers = #tpu.dot_dimension_numbers<[1], [0], [0], [1], [0, 0, 1, 1], [], []>} : vector<8x16xf32>, vector<16x16xf32>, vector<8x16xf32> -> vector<8x16xf32>
    %252 = vector.broadcast %250 : vector<8x1xf32> to vector<8x16xf32>
    %253 = arith.mulf %252, %251 : vector<8x16xf32>
    %cst_96 = arith.constant dense<0.000000e+00> : vector<8x8xf32>
    %254 = tpu.matmul %182, %190, %cst_96 {dimension_numbers = #tpu.dot_dimension_numbers<[1], [1], [0], [0], [0, 0, 1, 0], [], []>} : vector<8x16xf32>, vector<8x16xf32>, vector<8x8xf32> -> vector<8x8xf32>
    %255 = arith.mulf %222, %254 : vector<8x8xf32>
    %cst_97 = arith.constant dense<0.000000e+00> : vector<8x16xf32>
    %256 = tpu.matmul %255, %249, %cst_97 {dimension_numbers = #tpu.dot_dimension_numbers<[1], [0], [0], [1], [0, 0, 1, 1], [], []>} : vector<8x8xf32>, vector<8x16xf32>, vector<8x16xf32> -> vector<8x16xf32>
    %257 = arith.addf %253, %256 : vector<8x16xf32>
    %258 = vector.broadcast %216 : vector<1x1xf32> to vector<8x1xf32>
    %259 = arith.subf %258, %214 : vector<8x1xf32>
    %260 = math.exp %259 : vector<8x1xf32>
    %261 = vector.broadcast %260 : vector<8x1xf32> to vector<8x16xf32>
    %262 = arith.mulf %261, %190 : vector<8x16xf32>
    %263 = math.exp %216 : vector<1x1xf32>
    %264 = vector.broadcast %263 : vector<1x1xf32> to vector<16x16xf32>
    %265 = arith.mulf %264, %227 : vector<16x16xf32>
    %cst_98 = arith.constant dense<0.000000e+00> : vector<16x16xf32>
    %266 = tpu.matmul %262, %249, %cst_98 {dimension_numbers = #tpu.dot_dimension_numbers<[0], [0], [1], [1], [0, 1, 1, 1], [], []>} : vector<8x16xf32>, vector<8x16xf32>, vector<16x16xf32> -> vector<16x16xf32>
    %267 = arith.addf %265, %266 : vector<16x16xf32>
    %c1_99 = arith.constant 1 : index
    %c0_100 = arith.constant 0 : index
    %c0_101 = arith.constant 0 : index
    %268 = vector.load %arg6[%c1_99, %c0_100, %c0_101] : memref<2x16x16xf32, #tpu.memory_space<vmem>>, vector<1x16x16xf32>
    %269 = vector.shape_cast %268 : vector<1x16x16xf32> to vector<16x16xf32>
    %270 = vector.shape_cast %267 : vector<16x16xf32> to vector<1x16x16xf32>
    tpu.vector_store %arg6[%c1_99, %c0_100, %c0_101], %270 {strides = array<i32>} : memref<2x16x16xf32, #tpu.memory_space<vmem>>, vector<1x16x16xf32>,
    %271 = tpu.concatenate %128, %257 in 1 : vector<8x16xf32>, vector<8x16xf32> -> vector<8x32xf32>
    %c0_102 = arith.constant 0 : index
    %c0_103 = arith.constant 0 : index
    %c0_104 = arith.constant 0 : index
    %272 = vector.load %arg5[%c0_102, %c0_103, %c0_104] : memref<1x8x32xf32, #tpu.memory_space<vmem>>, vector<1x8x32xf32>
    %273 = vector.shape_cast %272 : vector<1x8x32xf32> to vector<8x32xf32>
    %274 = vector.shape_cast %271 : vector<8x32xf32> to vector<1x8x32xf32>
    tpu.vector_store %arg5[%c0_102, %c0_103, %c0_104], %274 {strides = array<i32>} : memref<1x8x32xf32, #tpu.memory_space<vmem>>, vector<1x8x32xf32>,
    return
  }
  func.func @transform_0(%arg0: i32, %arg1: i32) -> (i32, i32, i32) {
    %c0_i32 = arith.constant 0 : i32
    %c0_i32_0 = arith.constant 0 : i32
    return %arg0, %arg1, %c0_i32 : i32, i32, i32
  }
  func.func @transform_1(%arg0: i32, %arg1: i32) -> (i32, i32, i32) {
    %c0_i32 = arith.constant 0 : i32
    %c0_i32_0 = arith.constant 0 : i32
    return %arg0, %arg1, %c0_i32 : i32, i32, i32
  }
  func.func @transform_2(%arg0: i32, %arg1: i32) -> (i32, i32) {
    %c0_i32 = arith.constant 0 : i32
    %c0_i32_0 = arith.constant 0 : i32
    %c0_i32_1 = arith.constant 0 : i32
    return %c0_i32, %c0_i32_0 : i32, i32
  }
  func.func @transform_3(%arg0: i32, %arg1: i32) -> (i32, i32, i32) {
    %c0_i32 = arith.constant 0 : i32
    %c0_i32_0 = arith.constant 0 : i32
    return %arg0, %arg1, %c0_i32 : i32, i32, i32
  }
}

module attributes {stable_mosaic.version = 11 : i64} {
  func.func @_gated_rmsnorm_kernel(%arg0: i32, %arg1: memref<32x16xf32, #tpu.memory_space<vmem>>, %arg2: memref<32x16xbf16, #tpu.memory_space<vmem>>, %arg3: memref<1x16xf32, #tpu.memory_space<vmem>>, %arg4: memref<32x16xbf16, #tpu.memory_space<vmem>>) attributes {dimension_semantics = [#tpu.dimension_semantics<parallel>], iteration_bounds = array<i64: 1>, scalar_prefetch = 0 : i64, scratch_operands = 0 : i64, tpu.core_type = #tpu.core_type<tc>, window_params = [{transform_indices = @transform_0, window_bounds = array<i64: 32, 16>}, {transform_indices = @transform_1, window_bounds = array<i64: 32, 16>}, {pipeline_mode = #tpu.pipeline_mode<synchronous>, transform_indices = @transform_2, window_bounds = array<i64: 1, 16>}, {transform_indices = @transform_3, window_bounds = array<i64: 32, 16>}]} {
    %c0 = arith.constant 0 : index
    %c0_0 = arith.constant 0 : index
    %0 = vector.load %arg1[%c0, %c0_0] : memref<32x16xf32, #tpu.memory_space<vmem>>, vector<32x16xf32>
    %c0_1 = arith.constant 0 : index
    %c0_2 = arith.constant 0 : index
    %1 = vector.load %arg2[%c0_1, %c0_2] : memref<32x16xbf16, #tpu.memory_space<vmem>>, vector<32x16xbf16>
    %2 = arith.extf %1 : vector<32x16xbf16> to vector<32x16xf32>
    %3 = arith.mulf %0, %0 : vector<32x16xf32>
    %cst = arith.constant dense<0.000000e+00> : vector<32xf32>
    %4 = vector.multi_reduction <add>, %3, %cst [1] : vector<32x16xf32> to vector<32xf32>
    %5 = vector.shape_cast %4 : vector<32xf32> to vector<32x1xf32>
    %cst_3 = arith.constant 1.600000e+01 : f32
    %6 = vector.broadcast %cst_3 : f32 to vector<32x1xf32>
    %7 = arith.divf %5, %6 : vector<32x1xf32>
    %cst_4 = arith.constant 9.99999974E-6 : f32
    %8 = vector.broadcast %cst_4 : f32 to vector<32x1xf32>
    %9 = arith.addf %7, %8 : vector<32x1xf32>
    %10 = math.rsqrt %9 : vector<32x1xf32>
    %11 = vector.broadcast %10 : vector<32x1xf32> to vector<32x16xf32>
    %12 = arith.mulf %0, %11 : vector<32x16xf32>
    %c0_5 = arith.constant 0 : index
    %c0_6 = arith.constant 0 : index
    %13 = vector.load %arg3[%c0_5, %c0_6] : memref<1x16xf32, #tpu.memory_space<vmem>>, vector<1x16xf32>
    %14 = vector.broadcast %13 : vector<1x16xf32> to vector<32x16xf32>
    %15 = arith.mulf %12, %14 : vector<32x16xf32>
    %16 = arith.negf %2 : vector<32x16xf32>
    %17 = math.exp %16 : vector<32x16xf32>
    %cst_7 = arith.constant 1.000000e+00 : f32
    %18 = vector.broadcast %cst_7 : f32 to vector<32x16xf32>
    %19 = arith.addf %18, %17 : vector<32x16xf32>
    %20 = arith.divf %18, %19 : vector<32x16xf32>
    %21 = arith.mulf %2, %20 : vector<32x16xf32>
    %22 = arith.mulf %15, %21 : vector<32x16xf32>
    %23 = arith.truncf %22 : vector<32x16xf32> to vector<32x16xbf16>
    %c0_8 = arith.constant 0 : index
    %c0_9 = arith.constant 0 : index
    %24 = vector.load %arg4[%c0_8, %c0_9] : memref<32x16xbf16, #tpu.memory_space<vmem>>, vector<32x16xbf16>
    tpu.vector_store %arg4[%c0_8, %c0_9], %23 {strides = array<i32>} : memref<32x16xbf16, #tpu.memory_space<vmem>>, vector<32x16xbf16>,
    return
  }
  func.func @transform_0(%arg0: i32) -> (i32, i32) {
    %c0_i32 = arith.constant 0 : i32
    %c0_i32_0 = arith.constant 0 : i32
    return %arg0, %c0_i32 : i32, i32
  }
  func.func @transform_1(%arg0: i32) -> (i32, i32) {
    %c0_i32 = arith.constant 0 : i32
    %c0_i32_0 = arith.constant 0 : i32
    return %arg0, %c0_i32 : i32, i32
  }
  func.func @transform_2(%arg0: i32) -> (i32, i32) {
    %c0_i32 = arith.constant 0 : i32
    %c0_i32_0 = arith.constant 0 : i32
    %c0_i32_1 = arith.constant 0 : i32
    return %c0_i32, %c0_i32_0 : i32, i32
  }
  func.func @transform_3(%arg0: i32) -> (i32, i32) {
    %c0_i32 = arith.constant 0 : i32
    %c0_i32_0 = arith.constant 0 : i32
    return %arg0, %c0_i32 : i32, i32
  }
}

module attributes {stable_mosaic.version = 11 : i64} {
  func.func @_matmul_kernel(%arg0: i32, %arg1: i32, %arg2: i32, %arg3: memref<16x128xbf16, #tpu.memory_space<vmem>>, %arg4: memref<128x128xbf16, #tpu.memory_space<vmem>>, %arg5: memref<16x128xf32, #tpu.memory_space<vmem>>, %arg6: memref<16x128xf32, #tpu.memory_space<vmem>>) attributes {dimension_semantics = [#tpu.dimension_semantics<parallel>, #tpu.dimension_semantics<parallel>, #tpu.dimension_semantics<arbitrary>], iteration_bounds = array<i64: 1, 1, 1>, scalar_prefetch = 0 : i64, scratch_operands = 1 : i64, tpu.core_type = #tpu.core_type<tc>, window_params = [{transform_indices = @transform_0, window_bounds = array<i64: 16, 128>}, {transform_indices = @transform_1, window_bounds = array<i64: 128, 128>}, {transform_indices = @transform_2, window_bounds = array<i64: 16, 128>}]} {
    %c0_i32 = arith.constant 0 : i32
    %0 = arith.cmpi eq, %arg2, %c0_i32 : i32
    %1 = arith.extui %0 : i1 to i32
    %c0_i32_0 = arith.constant 0 : i32
    %2 = arith.cmpi ne, %1, %c0_i32_0 : i32
    scf.if %2 {
      %cst_10 = arith.constant 0.000000e+00 : f32
      %12 = vector.broadcast %cst_10 : f32 to vector<16x128xf32>
      %c0_11 = arith.constant 0 : index
      %c0_12 = arith.constant 0 : index
      %13 = vector.load %arg6[%c0_11, %c0_12] : memref<16x128xf32, #tpu.memory_space<vmem>>, vector<16x128xf32>
      tpu.vector_store %arg6[%c0_11, %c0_12], %12 {strides = array<i32>} : memref<16x128xf32, #tpu.memory_space<vmem>>, vector<16x128xf32>,
    } else {
    }
    %c0 = arith.constant 0 : index
    %c0_1 = arith.constant 0 : index
    %3 = vector.load %arg3[%c0, %c0_1] : memref<16x128xbf16, #tpu.memory_space<vmem>>, vector<16x128xbf16>
    %c0_2 = arith.constant 0 : index
    %c0_3 = arith.constant 0 : index
    %4 = vector.load %arg6[%c0_2, %c0_3] : memref<16x128xf32, #tpu.memory_space<vmem>>, vector<16x128xf32>
    %c0_4 = arith.constant 0 : index
    %c0_5 = arith.constant 0 : index
    %5 = vector.load %arg4[%c0_4, %c0_5] : memref<128x128xbf16, #tpu.memory_space<vmem>>, vector<128x128xbf16>
    %cst = arith.constant dense<0.000000e+00> : vector<16x128xf32>
    %6 = tpu.matmul %3, %5, %cst {dimension_numbers = #tpu.dot_dimension_numbers<[1], [0], [0], [1], [0, 0, 1, 1], [], []>} : vector<16x128xbf16>, vector<128x128xbf16>, vector<16x128xf32> -> vector<16x128xf32>
    %7 = arith.addf %4, %6 : vector<16x128xf32>
    %c0_6 = arith.constant 0 : index
    %c0_7 = arith.constant 0 : index
    %8 = vector.load %arg6[%c0_6, %c0_7] : memref<16x128xf32, #tpu.memory_space<vmem>>, vector<16x128xf32>
    tpu.vector_store %arg6[%c0_6, %c0_7], %7 {strides = array<i32>} : memref<16x128xf32, #tpu.memory_space<vmem>>, vector<16x128xf32>,
    %c0_i32_8 = arith.constant 0 : i32
    %9 = arith.cmpi eq, %arg2, %c0_i32_8 : i32
    %10 = arith.extui %9 : i1 to i32
    %c0_i32_9 = arith.constant 0 : i32
    %11 = arith.cmpi ne, %10, %c0_i32_9 : i32
    scf.if %11 {
      %c0_10 = arith.constant 0 : index
      %c0_11 = arith.constant 0 : index
      %12 = vector.load %arg6[%c0_10, %c0_11] : memref<16x128xf32, #tpu.memory_space<vmem>>, vector<16x128xf32>
      %c0_12 = arith.constant 0 : index
      %c0_13 = arith.constant 0 : index
      %13 = vector.load %arg5[%c0_12, %c0_13] : memref<16x128xf32, #tpu.memory_space<vmem>>, vector<16x128xf32>
      tpu.vector_store %arg5[%c0_12, %c0_13], %12 {strides = array<i32>} : memref<16x128xf32, #tpu.memory_space<vmem>>, vector<16x128xf32>,
    } else {
    }
    return
  }
  func.func @transform_0(%arg0: i32, %arg1: i32, %arg2: i32) -> (i32, i32) {
    %c0_i32 = arith.constant 0 : i32
    return %arg0, %arg2 : i32, i32
  }
  func.func @transform_1(%arg0: i32, %arg1: i32, %arg2: i32) -> (i32, i32) {
    %c0_i32 = arith.constant 0 : i32
    return %arg2, %arg1 : i32, i32
  }
  func.func @transform_2(%arg0: i32, %arg1: i32, %arg2: i32) -> (i32, i32) {
    %c0_i32 = arith.constant 0 : i32
    return %arg0, %arg1 : i32, i32
  }
}

module attributes {stable_mosaic.version = 11 : i64} {
  func.func @_matmul_kernel(%arg0: i32, %arg1: i32, %arg2: i32, %arg3: memref<16x128xf32, #tpu.memory_space<vmem>>, %arg4: memref<128x128xbf16, #tpu.memory_space<vmem>>, %arg5: memref<16x128xbf16, #tpu.memory_space<vmem>>, %arg6: memref<16x128xf32, #tpu.memory_space<vmem>>) attributes {dimension_semantics = [#tpu.dimension_semantics<parallel>, #tpu.dimension_semantics<parallel>, #tpu.dimension_semantics<arbitrary>], iteration_bounds = array<i64: 1, 1, 1>, scalar_prefetch = 0 : i64, scratch_operands = 1 : i64, tpu.core_type = #tpu.core_type<tc>, window_params = [{transform_indices = @transform_0, window_bounds = array<i64: 16, 128>}, {transform_indices = @transform_1, window_bounds = array<i64: 128, 128>}, {transform_indices = @transform_2, window_bounds = array<i64: 16, 128>}]} {
    %c0_i32 = arith.constant 0 : i32
    %0 = arith.cmpi eq, %arg2, %c0_i32 : i32
    %1 = arith.extui %0 : i1 to i32
    %c0_i32_0 = arith.constant 0 : i32
    %2 = arith.cmpi ne, %1, %c0_i32_0 : i32
    scf.if %2 {
      %cst_14 = arith.constant 0.000000e+00 : f32
      %25 = vector.broadcast %cst_14 : f32 to vector<16x128xf32>
      %c0_15 = arith.constant 0 : index
      %c0_16 = arith.constant 0 : index
      %26 = vector.load %arg6[%c0_15, %c0_16] : memref<16x128xf32, #tpu.memory_space<vmem>>, vector<16x128xf32>
      tpu.vector_store %arg6[%c0_15, %c0_16], %25 {strides = array<i32>} : memref<16x128xf32, #tpu.memory_space<vmem>>, vector<16x128xf32>,
    } else {
    }
    %c0 = arith.constant 0 : index
    %c0_1 = arith.constant 0 : index
    %3 = vector.load %arg3[%c0, %c0_1] : memref<16x128xf32, #tpu.memory_space<vmem>>, vector<16x128xf32>
    %4 = arith.mulf %3, %3 : vector<16x128xf32>
    %cst = arith.constant dense<0.000000e+00> : vector<16xf32>
    %5 = vector.multi_reduction <add>, %4, %cst [1] : vector<16x128xf32> to vector<16xf32>
    %6 = vector.shape_cast %5 : vector<16xf32> to vector<16x1xf32>
    %cst_2 = arith.constant 3.125000e-02 : f32
    %7 = vector.broadcast %cst_2 : f32 to vector<16x1xf32>
    %8 = arith.mulf %6, %7 : vector<16x1xf32>
    %cst_3 = arith.constant 1.1920929E-7 : f32
    %9 = vector.broadcast %cst_3 : f32 to vector<16x1xf32>
    %10 = arith.addf %8, %9 : vector<16x1xf32>
    %11 = math.rsqrt %10 : vector<16x1xf32>
    %12 = vector.broadcast %11 : vector<16x1xf32> to vector<16x128xf32>
    %13 = arith.mulf %3, %12 : vector<16x128xf32>
    %cst_4 = arith.constant 1.000000e+00 : f32
    %14 = vector.broadcast %cst_4 : f32 to vector<16x128xf32>
    %15 = arith.mulf %13, %14 : vector<16x128xf32>
    %16 = arith.truncf %15 : vector<16x128xf32> to vector<16x128xbf16>
    %c0_5 = arith.constant 0 : index
    %c0_6 = arith.constant 0 : index
    %17 = vector.load %arg6[%c0_5, %c0_6] : memref<16x128xf32, #tpu.memory_space<vmem>>, vector<16x128xf32>
    %c0_7 = arith.constant 0 : index
    %c0_8 = arith.constant 0 : index
    %18 = vector.load %arg4[%c0_7, %c0_8] : memref<128x128xbf16, #tpu.memory_space<vmem>>, vector<128x128xbf16>
    %cst_9 = arith.constant dense<0.000000e+00> : vector<16x128xf32>
    %19 = tpu.matmul %16, %18, %cst_9 {dimension_numbers = #tpu.dot_dimension_numbers<[1], [0], [0], [1], [0, 0, 1, 1], [], []>} : vector<16x128xbf16>, vector<128x128xbf16>, vector<16x128xf32> -> vector<16x128xf32>
    %20 = arith.addf %17, %19 : vector<16x128xf32>
    %c0_10 = arith.constant 0 : index
    %c0_11 = arith.constant 0 : index
    %21 = vector.load %arg6[%c0_10, %c0_11] : memref<16x128xf32, #tpu.memory_space<vmem>>, vector<16x128xf32>
    tpu.vector_store %arg6[%c0_10, %c0_11], %20 {strides = array<i32>} : memref<16x128xf32, #tpu.memory_space<vmem>>, vector<16x128xf32>,
    %c0_i32_12 = arith.constant 0 : i32
    %22 = arith.cmpi eq, %arg2, %c0_i32_12 : i32
    %23 = arith.extui %22 : i1 to i32
    %c0_i32_13 = arith.constant 0 : i32
    %24 = arith.cmpi ne, %23, %c0_i32_13 : i32
    scf.if %24 {
      %c0_14 = arith.constant 0 : index
      %c0_15 = arith.constant 0 : index
      %25 = vector.load %arg6[%c0_14, %c0_15] : memref<16x128xf32, #tpu.memory_space<vmem>>, vector<16x128xf32>
      %cst_16 = arith.constant 0.000000e+00 : f32
      %26 = vector.broadcast %cst_16 : f32 to vector<16x128xf32>
      %27 = arith.maximumf %25, %26 : vector<16x128xf32>
      %28 = arith.mulf %27, %27 : vector<16x128xf32>
      %29 = arith.truncf %28 : vector<16x128xf32> to vector<16x128xbf16>
      %c0_17 = arith.constant 0 : index
      %c0_18 = arith.constant 0 : index
      %30 = vector.load %arg5[%c0_17, %c0_18] : memref<16x128xbf16, #tpu.memory_space<vmem>>, vector<16x128xbf16>
      tpu.vector_store %arg5[%c0_17, %c0_18], %29 {strides = array<i32>} : memref<16x128xbf16, #tpu.memory_space<vmem>>, vector<16x128xbf16>,
    } else {
    }
    return
  }
  func.func @transform_0(%arg0: i32, %arg1: i32, %arg2: i32) -> (i32, i32) {
    %c0_i32 = arith.constant 0 : i32
    return %arg0, %arg2 : i32, i32
  }
  func.func @transform_1(%arg0: i32, %arg1: i32, %arg2: i32) -> (i32, i32) {
    %c0_i32 = arith.constant 0 : i32
    return %arg2, %arg1 : i32, i32
  }
  func.func @transform_2(%arg0: i32, %arg1: i32, %arg2: i32) -> (i32, i32) {
    %c0_i32 = arith.constant 0 : i32
    return %arg0, %arg1 : i32, i32
  }
}

module attributes {stable_mosaic.version = 11 : i64} {
  func.func @_matmul_kernel(%arg0: i32, %arg1: i32, %arg2: i32, %arg3: memref<16x128xf32, #tpu.memory_space<vmem>>, %arg4: memref<128x256xbf16, #tpu.memory_space<vmem>>, %arg5: memref<16x256xbf16, #tpu.memory_space<vmem>>, %arg6: memref<16x256xf32, #tpu.memory_space<vmem>>) attributes {dimension_semantics = [#tpu.dimension_semantics<parallel>, #tpu.dimension_semantics<parallel>, #tpu.dimension_semantics<arbitrary>], iteration_bounds = array<i64: 1, 1, 1>, scalar_prefetch = 0 : i64, scratch_operands = 1 : i64, tpu.core_type = #tpu.core_type<tc>, window_params = [{transform_indices = @transform_0, window_bounds = array<i64: 16, 128>}, {transform_indices = @transform_1, window_bounds = array<i64: 128, 256>}, {transform_indices = @transform_2, window_bounds = array<i64: 16, 256>}]} {
    %c0_i32 = arith.constant 0 : i32
    %0 = arith.cmpi eq, %arg2, %c0_i32 : i32
    %1 = arith.extui %0 : i1 to i32
    %c0_i32_0 = arith.constant 0 : i32
    %2 = arith.cmpi ne, %1, %c0_i32_0 : i32
    scf.if %2 {
      %cst_14 = arith.constant 0.000000e+00 : f32
      %25 = vector.broadcast %cst_14 : f32 to vector<16x256xf32>
      %c0_15 = arith.constant 0 : index
      %c0_16 = arith.constant 0 : index
      %26 = vector.load %arg6[%c0_15, %c0_16] : memref<16x256xf32, #tpu.memory_space<vmem>>, vector<16x256xf32>
      tpu.vector_store %arg6[%c0_15, %c0_16], %25 {strides = array<i32>} : memref<16x256xf32, #tpu.memory_space<vmem>>, vector<16x256xf32>,
    } else {
    }
    %c0 = arith.constant 0 : index
    %c0_1 = arith.constant 0 : index
    %3 = vector.load %arg3[%c0, %c0_1] : memref<16x128xf32, #tpu.memory_space<vmem>>, vector<16x128xf32>
    %4 = arith.mulf %3, %3 : vector<16x128xf32>
    %cst = arith.constant dense<0.000000e+00> : vector<16xf32>
    %5 = vector.multi_reduction <add>, %4, %cst [1] : vector<16x128xf32> to vector<16xf32>
    %6 = vector.shape_cast %5 : vector<16xf32> to vector<16x1xf32>
    %cst_2 = arith.constant 3.125000e-02 : f32
    %7 = vector.broadcast %cst_2 : f32 to vector<16x1xf32>
    %8 = arith.mulf %6, %7 : vector<16x1xf32>
    %cst_3 = arith.constant 1.1920929E-7 : f32
    %9 = vector.broadcast %cst_3 : f32 to vector<16x1xf32>
    %10 = arith.addf %8, %9 : vector<16x1xf32>
    %11 = math.rsqrt %10 : vector<16x1xf32>
    %12 = vector.broadcast %11 : vector<16x1xf32> to vector<16x128xf32>
    %13 = arith.mulf %3, %12 : vector<16x128xf32>
    %cst_4 = arith.constant 0.707106769 : f32
    %14 = vector.broadcast %cst_4 : f32 to vector<16x128xf32>
    %15 = arith.mulf %13, %14 : vector<16x128xf32>
    %16 = arith.truncf %15 : vector<16x128xf32> to vector<16x128xbf16>
    %c0_5 = arith.constant 0 : index
    %c0_6 = arith.constant 0 : index
    %17 = vector.load %arg6[%c0_5, %c0_6] : memref<16x256xf32, #tpu.memory_space<vmem>>, vector<16x256xf32>
    %c0_7 = arith.constant 0 : index
    %c0_8 = arith.constant 0 : index
    %18 = vector.load %arg4[%c0_7, %c0_8] : memref<128x256xbf16, #tpu.memory_space<vmem>>, vector<128x256xbf16>
    %cst_9 = arith.constant dense<0.000000e+00> : vector<16x256xf32>
    %19 = tpu.matmul %16, %18, %cst_9 {dimension_numbers = #tpu.dot_dimension_numbers<[1], [0], [0], [1], [0, 0, 1, 1], [], []>} : vector<16x128xbf16>, vector<128x256xbf16>, vector<16x256xf32> -> vector<16x256xf32>
    %20 = arith.addf %17, %19 : vector<16x256xf32>
    %c0_10 = arith.constant 0 : index
    %c0_11 = arith.constant 0 : index
    %21 = vector.load %arg6[%c0_10, %c0_11] : memref<16x256xf32, #tpu.memory_space<vmem>>, vector<16x256xf32>
    tpu.vector_store %arg6[%c0_10, %c0_11], %20 {strides = array<i32>} : memref<16x256xf32, #tpu.memory_space<vmem>>, vector<16x256xf32>,
    %c0_i32_12 = arith.constant 0 : i32
    %22 = arith.cmpi eq, %arg2, %c0_i32_12 : i32
    %23 = arith.extui %22 : i1 to i32
    %c0_i32_13 = arith.constant 0 : i32
    %24 = arith.cmpi ne, %23, %c0_i32_13 : i32
    scf.if %24 {
      %c0_14 = arith.constant 0 : index
      %c0_15 = arith.constant 0 : index
      %25 = vector.load %arg6[%c0_14, %c0_15] : memref<16x256xf32, #tpu.memory_space<vmem>>, vector<16x256xf32>
      %26 = arith.truncf %25 : vector<16x256xf32> to vector<16x256xbf16>
      %c0_16 = arith.constant 0 : index
      %c0_17 = arith.constant 0 : index
      %27 = vector.load %arg5[%c0_16, %c0_17] : memref<16x256xbf16, #tpu.memory_space<vmem>>, vector<16x256xbf16>
      tpu.vector_store %arg5[%c0_16, %c0_17], %26 {strides = array<i32>} : memref<16x256xbf16, #tpu.memory_space<vmem>>, vector<16x256xbf16>,
    } else {
    }
    return
  }
  func.func @transform_0(%arg0: i32, %arg1: i32, %arg2: i32) -> (i32, i32) {
    %c0_i32 = arith.constant 0 : i32
    return %arg0, %arg2 : i32, i32
  }
  func.func @transform_1(%arg0: i32, %arg1: i32, %arg2: i32) -> (i32, i32) {
    %c0_i32 = arith.constant 0 : i32
    return %arg2, %arg1 : i32, i32
  }
  func.func @transform_2(%arg0: i32, %arg1: i32, %arg2: i32) -> (i32, i32) {
    %c0_i32 = arith.constant 0 : i32
    return %arg0, %arg1 : i32, i32
  }
}

module attributes {stable_mosaic.version = 11 : i64} {
  func.func @_matmul_kernel(%arg0: i32, %arg1: i32, %arg2: i32, %arg3: memref<16x128xf32, #tpu.memory_space<vmem>>, %arg4: memref<128x128xbf16, #tpu.memory_space<vmem>>, %arg5: memref<16x128xbf16, #tpu.memory_space<vmem>>, %arg6: memref<16x128xf32, #tpu.memory_space<vmem>>) attributes {dimension_semantics = [#tpu.dimension_semantics<parallel>, #tpu.dimension_semantics<parallel>, #tpu.dimension_semantics<arbitrary>], iteration_bounds = array<i64: 1, 1, 1>, scalar_prefetch = 0 : i64, scratch_operands = 1 : i64, tpu.core_type = #tpu.core_type<tc>, window_params = [{transform_indices = @transform_0, window_bounds = array<i64: 16, 128>}, {transform_indices = @transform_1, window_bounds = array<i64: 128, 128>}, {transform_indices = @transform_2, window_bounds = array<i64: 16, 128>}]} {
    %c0_i32 = arith.constant 0 : i32
    %0 = arith.cmpi eq, %arg2, %c0_i32 : i32
    %1 = arith.extui %0 : i1 to i32
    %c0_i32_0 = arith.constant 0 : i32
    %2 = arith.cmpi ne, %1, %c0_i32_0 : i32
    scf.if %2 {
      %cst_14 = arith.constant 0.000000e+00 : f32
      %25 = vector.broadcast %cst_14 : f32 to vector<16x128xf32>
      %c0_15 = arith.constant 0 : index
      %c0_16 = arith.constant 0 : index
      %26 = vector.load %arg6[%c0_15, %c0_16] : memref<16x128xf32, #tpu.memory_space<vmem>>, vector<16x128xf32>
      tpu.vector_store %arg6[%c0_15, %c0_16], %25 {strides = array<i32>} : memref<16x128xf32, #tpu.memory_space<vmem>>, vector<16x128xf32>,
    } else {
    }
    %c0 = arith.constant 0 : index
    %c0_1 = arith.constant 0 : index
    %3 = vector.load %arg3[%c0, %c0_1] : memref<16x128xf32, #tpu.memory_space<vmem>>, vector<16x128xf32>
    %4 = arith.mulf %3, %3 : vector<16x128xf32>
    %cst = arith.constant dense<0.000000e+00> : vector<16xf32>
    %5 = vector.multi_reduction <add>, %4, %cst [1] : vector<16x128xf32> to vector<16xf32>
    %6 = vector.shape_cast %5 : vector<16xf32> to vector<16x1xf32>
    %cst_2 = arith.constant 3.125000e-02 : f32
    %7 = vector.broadcast %cst_2 : f32 to vector<16x1xf32>
    %8 = arith.mulf %6, %7 : vector<16x1xf32>
    %cst_3 = arith.constant 1.1920929E-7 : f32
    %9 = vector.broadcast %cst_3 : f32 to vector<16x1xf32>
    %10 = arith.addf %8, %9 : vector<16x1xf32>
    %11 = math.rsqrt %10 : vector<16x1xf32>
    %12 = vector.broadcast %11 : vector<16x1xf32> to vector<16x128xf32>
    %13 = arith.mulf %3, %12 : vector<16x128xf32>
    %cst_4 = arith.constant 0.707106769 : f32
    %14 = vector.broadcast %cst_4 : f32 to vector<16x128xf32>
    %15 = arith.mulf %13, %14 : vector<16x128xf32>
    %16 = arith.truncf %15 : vector<16x128xf32> to vector<16x128xbf16>
    %c0_5 = arith.constant 0 : index
    %c0_6 = arith.constant 0 : index
    %17 = vector.load %arg6[%c0_5, %c0_6] : memref<16x128xf32, #tpu.memory_space<vmem>>, vector<16x128xf32>
    %c0_7 = arith.constant 0 : index
    %c0_8 = arith.constant 0 : index
    %18 = vector.load %arg4[%c0_7, %c0_8] : memref<128x128xbf16, #tpu.memory_space<vmem>>, vector<128x128xbf16>
    %cst_9 = arith.constant dense<0.000000e+00> : vector<16x128xf32>
    %19 = tpu.matmul %16, %18, %cst_9 {dimension_numbers = #tpu.dot_dimension_numbers<[1], [0], [0], [1], [0, 0, 1, 1], [], []>} : vector<16x128xbf16>, vector<128x128xbf16>, vector<16x128xf32> -> vector<16x128xf32>
    %20 = arith.addf %17, %19 : vector<16x128xf32>
    %c0_10 = arith.constant 0 : index
    %c0_11 = arith.constant 0 : index
    %21 = vector.load %arg6[%c0_10, %c0_11] : memref<16x128xf32, #tpu.memory_space<vmem>>, vector<16x128xf32>
    tpu.vector_store %arg6[%c0_10, %c0_11], %20 {strides = array<i32>} : memref<16x128xf32, #tpu.memory_space<vmem>>, vector<16x128xf32>,
    %c0_i32_12 = arith.constant 0 : i32
    %22 = arith.cmpi eq, %arg2, %c0_i32_12 : i32
    %23 = arith.extui %22 : i1 to i32
    %c0_i32_13 = arith.constant 0 : i32
    %24 = arith.cmpi ne, %23, %c0_i32_13 : i32
    scf.if %24 {
      %c0_14 = arith.constant 0 : index
      %c0_15 = arith.constant 0 : index
      %25 = vector.load %arg6[%c0_14, %c0_15] : memref<16x128xf32, #tpu.memory_space<vmem>>, vector<16x128xf32>
      %cst_16 = arith.constant 0.000000e+00 : f32
      %26 = vector.broadcast %cst_16 : f32 to vector<16x128xf32>
      %27 = arith.maximumf %25, %26 : vector<16x128xf32>
      %28 = arith.mulf %27, %27 : vector<16x128xf32>
      %29 = arith.truncf %28 : vector<16x128xf32> to vector<16x128xbf16>
      %c0_17 = arith.constant 0 : index
      %c0_18 = arith.constant 0 : index
      %30 = vector.load %arg5[%c0_17, %c0_18] : memref<16x128xbf16, #tpu.memory_space<vmem>>, vector<16x128xbf16>
      tpu.vector_store %arg5[%c0_17, %c0_18], %29 {strides = array<i32>} : memref<16x128xbf16, #tpu.memory_space<vmem>>, vector<16x128xbf16>,
    } else {
    }
    return
  }
  func.func @transform_0(%arg0: i32, %arg1: i32, %arg2: i32) -> (i32, i32) {
    %c0_i32 = arith.constant 0 : i32
    return %arg0, %arg2 : i32, i32
  }
  func.func @transform_1(%arg0: i32, %arg1: i32, %arg2: i32) -> (i32, i32) {
    %c0_i32 = arith.constant 0 : i32
    return %arg2, %arg1 : i32, i32
  }
  func.func @transform_2(%arg0: i32, %arg1: i32, %arg2: i32) -> (i32, i32) {
    %c0_i32 = arith.constant 0 : i32
    return %arg0, %arg1 : i32, i32
  }
}

module attributes {stable_mosaic.version = 11 : i64} {
  func.func @_matmul_kernel(%arg0: i32, %arg1: i32, %arg2: i32, %arg3: memref<16x128xf32, #tpu.memory_space<vmem>>, %arg4: memref<128x128xbf16, #tpu.memory_space<vmem>>, %arg5: memref<16x128xf32, #tpu.memory_space<vmem>>, %arg6: memref<16x128xf32, #tpu.memory_space<vmem>>) attributes {dimension_semantics = [#tpu.dimension_semantics<parallel>, #tpu.dimension_semantics<parallel>, #tpu.dimension_semantics<arbitrary>], iteration_bounds = array<i64: 1, 1, 1>, scalar_prefetch = 0 : i64, scratch_operands = 1 : i64, tpu.core_type = #tpu.core_type<tc>, window_params = [{transform_indices = @transform_0, window_bounds = array<i64: 16, 128>}, {transform_indices = @transform_1, window_bounds = array<i64: 128, 128>}, {transform_indices = @transform_2, window_bounds = array<i64: 16, 128>}]} {
    %c0_i32 = arith.constant 0 : i32
    %0 = arith.cmpi eq, %arg2, %c0_i32 : i32
    %1 = arith.extui %0 : i1 to i32
    %c0_i32_0 = arith.constant 0 : i32
    %2 = arith.cmpi ne, %1, %c0_i32_0 : i32
    scf.if %2 {
      %cst_14 = arith.constant 0.000000e+00 : f32
      %25 = vector.broadcast %cst_14 : f32 to vector<16x128xf32>
      %c0_15 = arith.constant 0 : index
      %c0_16 = arith.constant 0 : index
      %26 = vector.load %arg6[%c0_15, %c0_16] : memref<16x128xf32, #tpu.memory_space<vmem>>, vector<16x128xf32>
      tpu.vector_store %arg6[%c0_15, %c0_16], %25 {strides = array<i32>} : memref<16x128xf32, #tpu.memory_space<vmem>>, vector<16x128xf32>,
    } else {
    }
    %c0 = arith.constant 0 : index
    %c0_1 = arith.constant 0 : index
    %3 = vector.load %arg3[%c0, %c0_1] : memref<16x128xf32, #tpu.memory_space<vmem>>, vector<16x128xf32>
    %4 = arith.mulf %3, %3 : vector<16x128xf32>
    %cst = arith.constant dense<0.000000e+00> : vector<16xf32>
    %5 = vector.multi_reduction <add>, %4, %cst [1] : vector<16x128xf32> to vector<16xf32>
    %6 = vector.shape_cast %5 : vector<16xf32> to vector<16x1xf32>
    %cst_2 = arith.constant 3.125000e-02 : f32
    %7 = vector.broadcast %cst_2 : f32 to vector<16x1xf32>
    %8 = arith.mulf %6, %7 : vector<16x1xf32>
    %cst_3 = arith.constant 1.1920929E-7 : f32
    %9 = vector.broadcast %cst_3 : f32 to vector<16x1xf32>
    %10 = arith.addf %8, %9 : vector<16x1xf32>
    %11 = math.rsqrt %10 : vector<16x1xf32>
    %12 = vector.broadcast %11 : vector<16x1xf32> to vector<16x128xf32>
    %13 = arith.mulf %3, %12 : vector<16x128xf32>
    %cst_4 = arith.constant 1.000000e+00 : f32
    %14 = vector.broadcast %cst_4 : f32 to vector<16x128xf32>
    %15 = arith.mulf %13, %14 : vector<16x128xf32>
    %16 = arith.truncf %15 : vector<16x128xf32> to vector<16x128xbf16>
    %c0_5 = arith.constant 0 : index
    %c0_6 = arith.constant 0 : index
    %17 = vector.load %arg6[%c0_5, %c0_6] : memref<16x128xf32, #tpu.memory_space<vmem>>, vector<16x128xf32>
    %c0_7 = arith.constant 0 : index
    %c0_8 = arith.constant 0 : index
    %18 = vector.load %arg4[%c0_7, %c0_8] : memref<128x128xbf16, #tpu.memory_space<vmem>>, vector<128x128xbf16>
    %cst_9 = arith.constant dense<0.000000e+00> : vector<16x128xf32>
    %19 = tpu.matmul %16, %18, %cst_9 {dimension_numbers = #tpu.dot_dimension_numbers<[1], [0], [0], [1], [0, 0, 1, 1], [], []>} : vector<16x128xbf16>, vector<128x128xbf16>, vector<16x128xf32> -> vector<16x128xf32>
    %20 = arith.addf %17, %19 : vector<16x128xf32>
    %c0_10 = arith.constant 0 : index
    %c0_11 = arith.constant 0 : index
    %21 = vector.load %arg6[%c0_10, %c0_11] : memref<16x128xf32, #tpu.memory_space<vmem>>, vector<16x128xf32>
    tpu.vector_store %arg6[%c0_10, %c0_11], %20 {strides = array<i32>} : memref<16x128xf32, #tpu.memory_space<vmem>>, vector<16x128xf32>,
    %c0_i32_12 = arith.constant 0 : i32
    %22 = arith.cmpi eq, %arg2, %c0_i32_12 : i32
    %23 = arith.extui %22 : i1 to i32
    %c0_i32_13 = arith.constant 0 : i32
    %24 = arith.cmpi ne, %23, %c0_i32_13 : i32
    scf.if %24 {
      %c0_14 = arith.constant 0 : index
      %c0_15 = arith.constant 0 : index
      %25 = vector.load %arg6[%c0_14, %c0_15] : memref<16x128xf32, #tpu.memory_space<vmem>>, vector<16x128xf32>
      %c0_16 = arith.constant 0 : index
      %c0_17 = arith.constant 0 : index
      %26 = vector.load %arg5[%c0_16, %c0_17] : memref<16x128xf32, #tpu.memory_space<vmem>>, vector<16x128xf32>
      tpu.vector_store %arg5[%c0_16, %c0_17], %25 {strides = array<i32>} : memref<16x128xf32, #tpu.memory_space<vmem>>, vector<16x128xf32>,
    } else {
    }
    return
  }
  func.func @transform_0(%arg0: i32, %arg1: i32, %arg2: i32) -> (i32, i32) {
    %c0_i32 = arith.constant 0 : i32
    return %arg0, %arg2 : i32, i32
  }
  func.func @transform_1(%arg0: i32, %arg1: i32, %arg2: i32) -> (i32, i32) {
    %c0_i32 = arith.constant 0 : i32
    return %arg2, %arg1 : i32, i32
  }
  func.func @transform_2(%arg0: i32, %arg1: i32, %arg2: i32) -> (i32, i32) {
    %c0_i32 = arith.constant 0 : i32
    return %arg0, %arg1 : i32, i32
  }
}

</mosaic_0001>

<bundles_post_ra>
// kernel: model_forward.14
= control target key start
LH: loop header
LB: loop body
LE: loop exit
PB: predicated region body
PF: predicated region fallthrough
CT: control target
= control target key end

     0   :  { %vm12_vm0 = vcmask 261120   ;;  %s64_s0 = inlined_call_operand.vmem [shape: f32[16,32], index: 0, kind: input, shape index: {}]   ;;  %s65_s1 = inlined_call_operand.vmem [shape: f32[16,32], index: 1, kind: output, shape index: {}]  }
   0x1   :  { %v8_v0 = vld [vmem:[%s64_s0] sm:$0xff]  ;;  %v9_v1 = vld [vmem:[%s64_s0 + $0x8] sm:$0xff] }
   0x2   :  { %v10_v2 = vmul.f32 %v8_v0, %v8_v0  ;;  %v11_v3 = vmul.f32 %v9_v1, %v9_v1 }
   0x4   :  { %v13_v4 = vsel %vm12_vm0, %v10_v2, 0.0  ;;  %v16_v5 = vsel %vm12_vm0, %v11_v3, 0.0 }
   0x5   :  { %14 = vadd.xlane.f32.xlu0 %v13_v4 }
   0x9   :  { %17 = vadd.xlane.f32.xlu0 %v16_v5 }
  0x8e   :  { %v15_v6 = vpop.xlane.xlu0 %14 }
  0x8f   :  { %v20_v7 = vmul.f32 0.03125, %v15_v6 }
  0x91   :  { %v22_v8 = vadd.f32 1.1920929e-07, %v20_v7 }
  0x92   :  { %v18_v9 = vpop.xlane.xlu0 %17 }
  0x93   :  { %34 = vrsqrt.f32 %v22_v8  ;;  %v21_v10 = vmul.f32 0.03125, %v18_v9 }
  0x95   :  { %v23_v11 = vadd.f32 1.1920929e-07, %v21_v10 }
  0x97   :  { %36 = vrsqrt.f32 %v23_v11 }
  0xa0   :  { %v35_v12 = vpop.eup %34 }
  0xa1   :  { %v26_v13 = vmul.f32 %v35_v12, %v8_v0 }
  0xa3   :  { %28 = vst.msk [vmem:[%s65_s1] sm:$0xff] %vm12_vm0, %v26_v13 }
  0xa4   :  { %v37_v14 = vpop.eup %36 }
  0xa5   :  { %v27_v15 = vmul.f32 %v37_v14, %v9_v1 }
  0xa7   :  { %29 = vst.msk [vmem:[%s65_s1 + $0x8] sm:$0xff] %vm12_vm0, %v27_v15 }

// kernel: model_forward.15
= control target key start
LH: loop header
LB: loop body
LE: loop exit
PB: predicated region body
PF: predicated region fallthrough
CT: control target
= control target key end

     0   :  { %v262_v16 = vmov 0   ;;  %s338_s0 = inlined_call_operand.vmem [shape: f32[16,128], index: 0, kind: input, shape index: {}]   ;;  %s339_s1 = inlined_call_operand.vmem [shape: bf16[128,256], index: 1, kind: input, shape index: {}]   ;;  %s340_s2 = inlined_call_operand.vmem [shape: bf16[16,256], index: 2, kind: output, shape index: {}]  }
   0x1   :  { %v20_v0 = vld [vmem:[%s338_s0] sm:$0xff]  ;;  %v21_v1 = vld [vmem:[%s338_s0 + $0x8] sm:$0xff]  ;;  %v234_v3 = vld [vmem:[%s339_s1 + $0x74] ss:$8 sps:$4 sm:$0xff]   ;;  %169 = vmatprep.mubr.bf16.mxu0 %v262_v16 }
   0x2   :  { %v22_v2 = vmul.f32 %v20_v0, %v20_v0  ;;  %v236_v4 = vld [vmem:[%s339_s1 + $0x70] ss:$8 sps:$4 sm:$0xff]   ;;  %v237_v5 = vld [vmem:[%s339_s1 + $0x64] ss:$8 sps:$4 sm:$0xff]   ;;  %v23_v6 = vmul.f32 %v21_v1, %v21_v1  ;;  %137 = vmatprep.subr.bf16.mxu0 %v234_v3  ;;  %v239_v7 = vld [vmem:[%s339_s1 + $0x60] ss:$8 sps:$4 sm:$0xff]  }
   0x3   :  { %138 = vmatpush1.bf16.msra.mxu0 %v236_v4  ;;  %v240_v8 = vld [vmem:[%s339_s1 + $0x54] ss:$8 sps:$4 sm:$0xff]   ;;  %v242_v9 = vld [vmem:[%s339_s1 + $0x50] ss:$8 sps:$4 sm:$0xff]   ;;  %v243_v10 = vld [vmem:[%s339_s1 + $0x44] ss:$8 sps:$4 sm:$0xff]  }
   0x4   :  { %24 = vadd.xlane.f32.xlu0 %v22_v2  ;;  %139 = vmatprep.subr.bf16.mxu0 %v237_v5  ;;  %v245_v11 = vld [vmem:[%s339_s1 + $0x40] ss:$8 sps:$4 sm:$0xff]   ;;  %v246_v12 = vld [vmem:[%s339_s1 + $0x34] ss:$8 sps:$4 sm:$0xff]   ;;  %v248_v13 = vld [vmem:[%s339_s1 + $0x30] ss:$8 sps:$4 sm:$0xff]  }
   0x5   :  { %v249_v14 = vld [vmem:[%s339_s1 + $0x24] ss:$8 sps:$4 sm:$0xff]   ;;  %v251_v15 = vld [vmem:[%s339_s1 + $0x20] ss:$8 sps:$4 sm:$0xff]   ;;  %v252_v17 = vld [vmem:[%s339_s1 + $0x14] ss:$8 sps:$4 sm:$0xff]  }
   0x6   :  { %v254_v18 = vld [vmem:[%s339_s1 + $0x10] ss:$8 sps:$4 sm:$0xff]   ;;  %v255_v19 = vld [vmem:[%s339_s1 + $0x4] ss:$8 sps:$4 sm:$0xff]   ;;  %v257_v20 = vld [vmem:[%s339_s1] ss:$8 sps:$4 sm:$0xff]  }
   0x7   :  { %140 = vmatpush1.bf16.msra.mxu0 %v239_v7 }
   0x8   :  { %26 = vadd.xlane.f32.xlu0 %v23_v6  ;;  %141 = vmatprep.subr.bf16.mxu0 %v240_v8 }
   0xb   :  { %142 = vmatpush1.bf16.msra.mxu0 %v242_v9 }
   0xc   :  { %143 = vmatprep.subr.bf16.mxu0 %v243_v10 }
   0xf   :  { %144 = vmatpush1.bf16.msra.mxu0 %v245_v11 }
  0x10   :  { %145 = vmatprep.subr.bf16.mxu0 %v246_v12 }
  0x13   :  { %146 = vmatpush1.bf16.msra.mxu0 %v248_v13 }
  0x14   :  { %147 = vmatprep.subr.bf16.mxu0 %v249_v14 }
  0x17   :  { %148 = vmatpush1.bf16.msra.mxu0 %v251_v15 }
  0x18   :  { %149 = vmatprep.subr.bf16.mxu0 %v252_v17 }
  0x1b   :  { %150 = vmatpush1.bf16.msra.mxu0 %v254_v18 }
  0x1c   :  { %151 = vmatprep.subr.bf16.mxu0 %v255_v19 }
  0x1f   :  { %152 = vmatpush1.bf16.msra.mxu0 %v257_v20 }
  0x8d   :  { %v25_v21 = vpop.xlane.xlu0 %24 }
  0x8e   :  { %v28_v22 = vmul.f32 0.03125, %v25_v21 }
  0x90   :  { %v30_v23 = vadd.f32 1.1920929e-07, %v28_v22 }
  0x91   :  { %v27_v24 = vpop.xlane.xlu0 %26 }
  0x92   :  { %v29_v25 = vmul.f32 0.03125, %v27_v24  ;;  %258 = vrsqrt.f32 %v30_v23 }
  0x94   :  { %v31_v26 = vadd.f32 1.1920929e-07, %v29_v25 }
  0x96   :  { %260 = vrsqrt.f32 %v31_v26 }
  0x9f   :  { %v259_v27 = vpop.eup %258 }
  0xa0   :  { %v34_v29 = vmul.f32 %v259_v27, %v20_v0 }
  0xa3   :  { %v261_v28 = vpop.eup %260 }
  0xa4   :  { %v35_v30 = vmul.f32 %v261_v28, %v21_v1 }
  0xa6   :  { %v36_v31 = vpack.c.bf16 %v35_v30, %v34_v29 }
  0xa8   :  { %170 = vmatmul.mubr.bf16.vlgmr.msra.gmra.mxu0 %v36_v31 }
 0x168   :  { %v171_v32 = vpop.f32.mrf.mxu0 }
 0x16a   :  { %v173_v33 = vpop.f32.mrf.mxu0 }
 0x16b   :  { %v231_v34 = vpack.c.bf16 %v173_v33, %v171_v32 }
 0x16c   :  { %v175_v35 = vpop.f32.mrf.mxu0 }
 0x16d   :  { %207 = vst [vmem:[%s340_s2] sm:$0xff] %v231_v34 }
 0x16e   :  { %v177_v36 = vpop.f32.mrf.mxu0 }
 0x16f   :  { %v232_v37 = vpack.c.bf16 %v177_v36, %v175_v35 }
 0x171   :  { %208 = vst [vmem:[%s340_s2 + $0x8] sm:$0xff] %v232_v37 }

// kernel: model_forward.17
= control target key start
LH: loop header
LB: loop body
LE: loop exit
PB: predicated region body
PF: predicated region fallthrough
CT: control target
= control target key end

     0   :  { %vm30_vm0 = vcmask 130048   ;;  %vm119_vm1 = vcmask 125952   ;;  %s251_s0 = inlined_call_operand.vmem [shape: f32[32,16], index: 0, kind: input, shape index: {}]   ;;  %s252_s1 = inlined_call_operand.vmem [shape: bf16[32,16], index: 1, kind: input, shape index: {}]   ;;  %s253_s2 = inlined_call_operand.vmem [shape: f32[1,16], index: 2, kind: input, shape index: {}]   ;;  %s254_s3 = inlined_call_operand.vmem [shape: bf16[32,16], index: 3, kind: output, shape index: {}]  }
   0x1   :  { %v197_v0 = vld [vmem:[%s251_s0 + $0x10] sm:$0xff]  ;;  %v202_v1 = vld [vmem:[%s251_s0] sm:$0xff]  ;;  %v207_v2 = vld [vmem:[%s251_s0 + $0x18] sm:$0xff] }
   0x2   :  { %v28_v3 = vmul.f32 %v197_v0, %v197_v0  ;;  %v26_v4 = vmul.f32 %v202_v1, %v202_v1  ;;  %v29_v5 = vmul.f32 %v207_v2, %v207_v2  ;;  %v218_v6 = vld [vmem:[%s251_s0 + $0x8] sm:$0xff]  ;;  %v228_v13 = vld [vmem:[%s252_s1] sm:$0xff]  }
   0x3   :  { %v27_v7 = vmul.f32 %v218_v6, %v218_v6  ;;  %v149_v12 = vld [vmem:[%s252_s1 + $0x8] sm:$0xff]   ;;  %v143_v15 = vunpack.c.l.bf16 %v228_v13  ;;  %v144_v19 = vunpack.c.h.bf16 %v228_v13  ;;  %v128_v45 = vld [vmem:[%s253_s2] ss:$0 sm:$0xff] }
   0x4   :  { %v37_v8 = vsel %vm30_vm0, %v28_v3, 0.0  ;;  %v31_v9 = vsel %vm30_vm0, %v26_v4, 0.0  ;;  %v40_v10 = vsel %vm30_vm0, %v29_v5, 0.0  ;;  %v147_v14 = vunpack.c.l.bf16 %v149_v12 }
   0x5   :  { %38 = vadd.xlane.f32.xlu1 %v37_v8  ;;  %32 = vadd.xlane.f32.xlu0 %v31_v9  ;;  %v34_v11 = vsel %vm30_vm0, %v27_v7, 0.0  ;;  %v148_v17 = vunpack.c.h.bf16 %v149_v12  ;;  %v129_v18 = vmul.f32 -1.442695, %v143_v15  ;;  %v130_v21 = vmul.f32 -1.442695, %v144_v19 }
   0x6   :  { %v131_v16 = vmul.f32 -1.442695, %v147_v14 }
   0x7   :  { %v132_v20 = vmul.f32 -1.442695, %v148_v17 }
   0x8   :  { %150 = vpow2.f32 %v131_v16 }
   0x9   :  { %41 = vadd.xlane.f32.xlu1 %v40_v10  ;;  %35 = vadd.xlane.f32.xlu0 %v34_v11  ;;  %152 = vpow2.f32 %v129_v18 }
   0xa   :  { %154 = vpow2.f32 %v132_v20 }
   0xb   :  { %156 = vpow2.f32 %v130_v21 }
  0x15   :  { %v151_v22 = vpop.eup %150 }
  0x16   :  { %v153_v23 = vpop.eup %152  ;;  %v85_v24 = vadd.f32 1.0, %v151_v22 }
  0x17   :  { %v155_v25 = vpop.eup %154  ;;  %v83_v27 = vadd.f32 1.0, %v153_v23 }
  0x18   :  { %v157_v29 = vpop.eup %156  ;;  %158 = vrcp.f32 %v85_v24  ;;  %v86_v34 = vadd.f32 1.0, %v155_v25 }
  0x19   :  { %160 = vrcp.f32 %v83_v27  ;;  %v84_v36 = vadd.f32 1.0, %v157_v29 }
  0x25   :  { %v159_v42 = vpop.eup %158 }
  0x26   :  { %v161_v43 = vpop.eup %160  ;;  %v97_v47 = vmul.f32 %v159_v42, %v147_v14 }
  0x27   :  { %v95_v50 = vmul.f32 %v161_v43, %v143_v15 }
  0x8e   :  { %v39_v26 = vpop.xlane.xlu1 %38  ;;  %v33_v28 = vpop.xlane.xlu0 %32 }
  0x8f   :  { %v46_v30 = vmul.f32 0.0625, %v39_v26  ;;  %v44_v31 = vmul.f32 0.0625, %v33_v28 }
  0x91   :  { %v50_v32 = vadd.f32 1e-05, %v46_v30  ;;  %v48_v33 = vadd.f32 1e-05, %v44_v31 }
  0x92   :  { %v42_v35 = vpop.xlane.xlu1 %41  ;;  %v36_v37 = vpop.xlane.xlu0 %35 }
  0x93   :  { %162 = vrsqrt.f32 %v50_v32  ;;  %v47_v38 = vmul.f32 0.0625, %v42_v35  ;;  %v45_v39 = vmul.f32 0.0625, %v36_v37 }
  0x94   :  { %164 = vrsqrt.f32 %v48_v33 }
  0x95   :  { %166 = vrcp.f32 %v86_v34  ;;  %v51_v40 = vadd.f32 1e-05, %v47_v38  ;;  %v49_v41 = vadd.f32 1e-05, %v45_v39 }
  0x96   :  { %168 = vrcp.f32 %v84_v36 }
  0x97   :  { %170 = vrsqrt.f32 %v51_v40 }
  0x98   :  { %172 = vrsqrt.f32 %v49_v41 }
  0xa0   :  { %v163_v44 = vpop.eup %162 }
  0xa1   :  { %v165_v46 = vpop.eup %164  ;;  %v58_v48 = vmul.f32 %v163_v44, %v197_v0 }
  0xa2   :  { %v167_v49 = vpop.eup %166  ;;  %v56_v51 = vmul.f32 %v165_v46, %v202_v1 }
  0xa3   :  { %v169_v52 = vpop.eup %168  ;;  %v69_v53 = vmul.f32 %v128_v45, %v58_v48  ;;  %v98_v58 = vmul.f32 %v167_v49, %v148_v17 }
  0xa4   :  { %v171_v54 = vpop.eup %170  ;;  %v67_v55 = vmul.f32 %v128_v45, %v56_v51  ;;  %v96_v61 = vmul.f32 %v169_v52, %v144_v19 }
  0xa5   :  { %v173_v56 = vpop.eup %172  ;;  %v101_v57 = vmul.f32 %v97_v47, %v69_v53  ;;  %v59_v59 = vmul.f32 %v171_v54, %v207_v2 }
  0xa6   :  { %v99_v60 = vmul.f32 %v95_v50, %v67_v55  ;;  %v57_v62 = vmul.f32 %v173_v56, %v218_v6 }
  0xa7   :  { %v139_v63 = vpack.c.bf16 %v101_v57, %v101_v57  ;;  %v70_v0 = vmul.f32 %v128_v45, %v59_v59 }
  0xa8   :  { %v137_v3 = vpack.c.bf16 %v99_v60, %v99_v60  ;;  %v68_v4 = vmul.f32 %v128_v45, %v57_v62 }
  0xa9   :  { %122 = vst.msk [vmem:[%s254_s3 + $0x8] sm:$0xf] %vm119_vm1, %v139_v63  ;;  %v102_v1 = vmul.f32 %v98_v58, %v70_v0 }
  0xaa   :  { %120 = vst.msk [vmem:[%s254_s3] sm:$0xf] %vm119_vm1, %v137_v3  ;;  %v100_v5 = vmul.f32 %v96_v61, %v68_v4 }
  0xab   :  { %v140_v2 = vpack.c.bf16 %v102_v1, %v102_v1 }
  0xac   :  { %v138_v7 = vpack.c.bf16 %v100_v5, %v100_v5 }
  0xad   :  { %123 = vst.msk [vmem:[%s254_s3 + $0xc] sm:$0xf] %vm119_vm1, %v140_v2 }
  0xae   :  { %121 = vst.msk [vmem:[%s254_s3 + $0x4] sm:$0xf] %vm119_vm1, %v138_v7 }

// kernel: model_forward.18
= control target key start
LH: loop header
LB: loop body
LE: loop exit
PB: predicated region body
PF: predicated region fallthrough
CT: control target
= control target key end

     0   :  { %v197_v0 = vmov 0.0   ;;  %vm198_vm0 = vmmov 0   ;;  %s247_s1 = inlined_call_operand.vmem [shape: bf16[128,128], index: 1, kind: input, shape index: {}]   ;;  %s248_s0 = inlined_call_operand.vmem [shape: bf16[16,128], index: 0, kind: input, shape index: {}]   ;;  %s249_s2 = inlined_call_operand.vmem [shape: f32[16,128], index: 2, kind: output, shape index: {}]  }
   0x1   :  { %166 = vmatprep.subr.bf16.mxu0 %v197_v0  ;;  %v188_v1 = vld [vmem:[%s247_s1 + $0x38] sm:$0xff]   ;;  %182 = vmatprep.mubr.msk.bf16.mxu0 %vm198_vm0, %v197_v0  ;;  %v189_v2 = vld [vmem:[%s247_s1 + $0x30] sm:$0xff]   ;;  %v190_v3 = vld [vmem:[%s247_s1 + $0x28] sm:$0xff]  }
   0x2   :  { %167 = vmatpush3.bf16.msra.mxu0 %v188_v1  ;;  %v191_v4 = vld [vmem:[%s247_s1 + $0x20] sm:$0xff]   ;;  %v192_v5 = vld [vmem:[%s247_s1 + $0x18] sm:$0xff]   ;;  %v193_v6 = vld [vmem:[%s247_s1 + $0x10] sm:$0xff]  }
   0x3   :  { %168 = vmatprep.subr.bf16.mxu0 %v197_v0  ;;  %v194_v7 = vld [vmem:[%s247_s1 + $0x8] sm:$0xff]   ;;  %v195_v8 = vld [vmem:[%s247_s1] sm:$0xff]  }
   0x4   :  { %v196_v9 = vld [vmem:[%s248_s0] sm:$0xff]  }
   0x6   :  { %169 = vmatpush3.bf16.msra.mxu0 %v189_v2 }
   0x7   :  { %170 = vmatprep.subr.bf16.mxu0 %v197_v0 }
   0xa   :  { %171 = vmatpush3.bf16.msra.mxu0 %v190_v3 }
   0xb   :  { %172 = vmatprep.subr.bf16.mxu0 %v197_v0 }
   0xe   :  { %173 = vmatpush3.bf16.msra.mxu0 %v191_v4 }
   0xf   :  { %174 = vmatprep.subr.bf16.mxu0 %v197_v0 }
  0x12   :  { %175 = vmatpush3.bf16.msra.mxu0 %v192_v5 }
  0x13   :  { %176 = vmatprep.subr.bf16.mxu0 %v197_v0 }
  0x16   :  { %177 = vmatpush3.bf16.msra.mxu0 %v193_v6 }
  0x17   :  { %178 = vmatprep.subr.bf16.mxu0 %v197_v0 }
  0x1a   :  { %179 = vmatpush3.bf16.msra.mxu0 %v194_v7 }
  0x1b   :  { %180 = vmatprep.subr.bf16.mxu0 %v197_v0 }
  0x1e   :  { %181 = vmatpush3.bf16.msra.mxu0 %v195_v8 }
  0x21   :  { %183 = vmatmul.mubr.bf16.vlgmr.msra.gmra.mxu0 %v196_v9 }
  0xe1   :  { %v126_v10 = vpop.f32.mrf.mxu0 }
  0xe2   :  { %142 = vst [vmem:[%s249_s2] sm:$0xff] %v126_v10 }
  0xe3   :  { %v184_v11 = vpop.f32.mrf.mxu0 }
  0xe5   :  { %v129_v12 = vpop.f32.mrf.mxu0 }
  0xe6   :  { %143 = vst [vmem:[%s249_s2 + $0x8] sm:$0xff] %v129_v12 }
  0xe7   :  { %v185_v13 = vpop.f32.mrf.mxu0 }

// kernel: model_forward.19
= control target key start
LH: loop header
LB: loop body
LE: loop exit
PB: predicated region body
PF: predicated region fallthrough
CT: control target
= control target key end

     0   :  { %v229_v2 = vmov 0.0   ;;  %vm230_vm0 = vmmov 0   ;;  %s279_s0 = inlined_call_operand.vmem [shape: f32[16,128], index: 0, kind: input, shape index: {}]   ;;  %s280_s1 = inlined_call_operand.vmem [shape: bf16[128,128], index: 1, kind: input, shape index: {}]   ;;  %s281_s2 = inlined_call_operand.vmem [shape: bf16[16,128], index: 2, kind: output, shape index: {}]  }
   0x1   :  { %v18_v0 = vld [vmem:[%s279_s0] sm:$0xff]  ;;  %v19_v1 = vld [vmem:[%s279_s0 + $0x8] sm:$0xff]  ;;  %195 = vmatprep.subr.bf16.mxu0 %v229_v2  ;;  %v217_v4 = vld [vmem:[%s280_s1 + $0x38] sm:$0xff]   ;;  %211 = vmatprep.mubr.msk.bf16.mxu0 %vm230_vm0, %v229_v2 }
   0x2   :  { %v20_v3 = vmul.f32 %v18_v0, %v18_v0  ;;  %v218_v5 = vld [vmem:[%s280_s1 + $0x30] sm:$0xff]   ;;  %v21_v6 = vmul.f32 %v19_v1, %v19_v1  ;;  %196 = vmatpush3.bf16.msra.mxu0 %v217_v4  ;;  %v219_v7 = vld [vmem:[%s280_s1 + $0x28] sm:$0xff]   ;;  %v220_v8 = vld [vmem:[%s280_s1 + $0x20] sm:$0xff]  }
   0x3   :  { %197 = vmatprep.subr.bf16.mxu0 %v229_v2  ;;  %v221_v9 = vld [vmem:[%s280_s1 + $0x18] sm:$0xff]   ;;  %v222_v10 = vld [vmem:[%s280_s1 + $0x10] sm:$0xff]   ;;  %v223_v11 = vld [vmem:[%s280_s1 + $0x8] sm:$0xff]  }
   0x4   :  { %22 = vadd.xlane.f32.xlu0 %v20_v3  ;;  %v224_v12 = vld [vmem:[%s280_s1] sm:$0xff]  }
   0x6   :  { %198 = vmatpush3.bf16.msra.mxu0 %v218_v5 }
   0x7   :  { %199 = vmatprep.subr.bf16.mxu0 %v229_v2 }
   0x8   :  { %24 = vadd.xlane.f32.xlu0 %v21_v6 }
   0xa   :  { %200 = vmatpush3.bf16.msra.mxu0 %v219_v7 }
   0xb   :  { %201 = vmatprep.subr.bf16.mxu0 %v229_v2 }
   0xe   :  { %202 = vmatpush3.bf16.msra.mxu0 %v220_v8 }
   0xf   :  { %203 = vmatprep.subr.bf16.mxu0 %v229_v2 }
  0x12   :  { %204 = vmatpush3.bf16.msra.mxu0 %v221_v9 }
  0x13   :  { %205 = vmatprep.subr.bf16.mxu0 %v229_v2 }
  0x16   :  { %206 = vmatpush3.bf16.msra.mxu0 %v222_v10 }
  0x17   :  { %207 = vmatprep.subr.bf16.mxu0 %v229_v2 }
  0x1a   :  { %208 = vmatpush3.bf16.msra.mxu0 %v223_v11 }
  0x1b   :  { %209 = vmatprep.subr.bf16.mxu0 %v229_v2 }
  0x1e   :  { %210 = vmatpush3.bf16.msra.mxu0 %v224_v12 }
  0x8d   :  { %v23_v13 = vpop.xlane.xlu0 %22 }
  0x8e   :  { %v26_v14 = vmul.f32 0.03125, %v23_v13 }
  0x90   :  { %v28_v15 = vadd.f32 1.1920929e-07, %v26_v14 }
  0x91   :  { %v25_v16 = vpop.xlane.xlu0 %24 }
  0x92   :  { %v27_v17 = vmul.f32 0.03125, %v25_v16  ;;  %225 = vrsqrt.f32 %v28_v15 }
  0x94   :  { %v29_v18 = vadd.f32 1.1920929e-07, %v27_v17 }
  0x96   :  { %227 = vrsqrt.f32 %v29_v18 }
  0x9f   :  { %v226_v19 = vpop.eup %225 }
  0xa0   :  { %v32_v21 = vmul.f32 %v226_v19, %v18_v0 }
  0xa3   :  { %v228_v20 = vpop.eup %227 }
  0xa4   :  { %v33_v22 = vmul.f32 %v228_v20, %v19_v1 }
  0xa6   :  { %v34_v23 = vpack.c.bf16 %v33_v22, %v32_v21 }
  0xa8   :  { %212 = vmatmul.mubr.bf16.vlgmr.msra.gmra.mxu0 %v34_v23 }
 0x168   :  { %v135_v24 = vpop.f32.mrf.mxu0 }
 0x169   :  { %v151_v26 = vmax.f32 %v135_v24, 0.0 }
 0x16a   :  { %v213_v25 = vpop.f32.mrf.mxu0 }
 0x16b   :  { %v153_v30 = vmul.f32 %v151_v26, %v151_v26 }
 0x16c   :  { %v138_v27 = vpop.f32.mrf.mxu0 }
 0x16d   :  { %v152_v28 = vmax.f32 %v138_v27, 0.0 }
 0x16e   :  { %v214_v29 = vpop.f32.mrf.mxu0 }
 0x16f   :  { %v154_v31 = vmul.f32 %v152_v28, %v152_v28 }
 0x171   :  { %v184_v32 = vpack.c.bf16 %v154_v31, %v153_v30 }
 0x173   :  { %185 = vst [vmem:[%s281_s2] sm:$0xff] %v184_v32  }

// kernel: model_forward.21
= control target key start
LH: loop header
LB: loop body
LE: loop exit
PB: predicated region body
PF: predicated region fallthrough
CT: control target
= control target key end

     0   :  { %v264_v15 = vmov 0   ;;  %s340_s0 = inlined_call_operand.vmem [shape: f32[16,128], index: 0, kind: input, shape index: {}]   ;;  %s341_s1 = inlined_call_operand.vmem [shape: bf16[128,256], index: 1, kind: input, shape index: {}]   ;;  %s342_s2 = inlined_call_operand.vmem [shape: bf16[16,256], index: 2, kind: output, shape index: {}]  }
   0x1   :  { %v20_v0 = vld [vmem:[%s340_s0] sm:$0xff]  ;;  %v21_v1 = vld [vmem:[%s340_s0 + $0x8] sm:$0xff]  ;;  %v236_v3 = vld [vmem:[%s341_s1 + $0x74] ss:$8 sps:$4 sm:$0xff]   ;;  %171 = vmatprep.mubr.bf16.mxu0 %v264_v15 }
   0x2   :  { %v22_v2 = vmul.f32 %v20_v0, %v20_v0  ;;  %v238_v4 = vld [vmem:[%s341_s1 + $0x70] ss:$8 sps:$4 sm:$0xff]   ;;  %v23_v5 = vmul.f32 %v21_v1, %v21_v1  ;;  %139 = vmatprep.subr.bf16.mxu0 %v236_v3  ;;  %v239_v6 = vld [vmem:[%s341_s1 + $0x64] ss:$8 sps:$4 sm:$0xff]   ;;  %v241_v7 = vld [vmem:[%s341_s1 + $0x60] ss:$8 sps:$4 sm:$0xff]  }
   0x3   :  { %140 = vmatpush1.bf16.msra.mxu0 %v238_v4  ;;  %v242_v8 = vld [vmem:[%s341_s1 + $0x54] ss:$8 sps:$4 sm:$0xff]   ;;  %v244_v9 = vld [vmem:[%s341_s1 + $0x50] ss:$8 sps:$4 sm:$0xff]   ;;  %v245_v10 = vld [vmem:[%s341_s1 + $0x44] ss:$8 sps:$4 sm:$0xff]  }
   0x4   :  { %24 = vadd.xlane.f32.xlu0 %v22_v2  ;;  %141 = vmatprep.subr.bf16.mxu0 %v239_v6  ;;  %v247_v11 = vld [vmem:[%s341_s1 + $0x40] ss:$8 sps:$4 sm:$0xff]   ;;  %v248_v12 = vld [vmem:[%s341_s1 + $0x34] ss:$8 sps:$4 sm:$0xff]   ;;  %v250_v13 = vld [vmem:[%s341_s1 + $0x30] ss:$8 sps:$4 sm:$0xff]  }
   0x5   :  { %v251_v14 = vld [vmem:[%s341_s1 + $0x24] ss:$8 sps:$4 sm:$0xff]   ;;  %v253_v16 = vld [vmem:[%s341_s1 + $0x20] ss:$8 sps:$4 sm:$0xff]   ;;  %v254_v17 = vld [vmem:[%s341_s1 + $0x14] ss:$8 sps:$4 sm:$0xff]  }
   0x6   :  { %v256_v18 = vld [vmem:[%s341_s1 + $0x10] ss:$8 sps:$4 sm:$0xff]   ;;  %v257_v19 = vld [vmem:[%s341_s1 + $0x4] ss:$8 sps:$4 sm:$0xff]   ;;  %v259_v20 = vld [vmem:[%s341_s1] ss:$8 sps:$4 sm:$0xff]  }
   0x7   :  { %142 = vmatpush1.bf16.msra.mxu0 %v241_v7 }
   0x8   :  { %26 = vadd.xlane.f32.xlu0 %v23_v5  ;;  %143 = vmatprep.subr.bf16.mxu0 %v242_v8 }
   0xb   :  { %144 = vmatpush1.bf16.msra.mxu0 %v244_v9 }
   0xc   :  { %145 = vmatprep.subr.bf16.mxu0 %v245_v10 }
   0xf   :  { %146 = vmatpush1.bf16.msra.mxu0 %v247_v11 }
  0x10   :  { %147 = vmatprep.subr.bf16.mxu0 %v248_v12 }
  0x13   :  { %148 = vmatpush1.bf16.msra.mxu0 %v250_v13 }
  0x14   :  { %149 = vmatprep.subr.bf16.mxu0 %v251_v14 }
  0x17   :  { %150 = vmatpush1.bf16.msra.mxu0 %v253_v16 }
  0x18   :  { %151 = vmatprep.subr.bf16.mxu0 %v254_v17 }
  0x1b   :  { %152 = vmatpush1.bf16.msra.mxu0 %v256_v18 }
  0x1c   :  { %153 = vmatprep.subr.bf16.mxu0 %v257_v19 }
  0x1f   :  { %154 = vmatpush1.bf16.msra.mxu0 %v259_v20 }
  0x8d   :  { %v25_v21 = vpop.xlane.xlu0 %24 }
  0x8e   :  { %v28_v22 = vmul.f32 0.03125, %v25_v21 }
  0x90   :  { %v30_v23 = vadd.f32 1.1920929e-07, %v28_v22 }
  0x91   :  { %v27_v24 = vpop.xlane.xlu0 %26 }
  0x92   :  { %260 = vrsqrt.f32 %v30_v23  ;;  %v29_v25 = vmul.f32 0.03125, %v27_v24 }
  0x94   :  { %v31_v26 = vadd.f32 1.1920929e-07, %v29_v25 }
  0x96   :  { %262 = vrsqrt.f32 %v31_v26 }
  0x9f   :  { %v261_v27 = vpop.eup %260 }
  0xa0   :  { %v34_v28 = vmul.f32 %v261_v27, %v20_v0 }
  0xa2   :  { %v36_v31 = vmul.f32 0.70710677, %v34_v28 }
  0xa3   :  { %v263_v29 = vpop.eup %262 }
  0xa4   :  { %v35_v30 = vmul.f32 %v263_v29, %v21_v1 }
  0xa6   :  { %v37_v32 = vmul.f32 0.70710677, %v35_v30 }
  0xa8   :  { %v38_v33 = vpack.c.bf16 %v37_v32, %v36_v31 }
  0xaa   :  { %172 = vmatmul.mubr.bf16.vlgmr.msra.gmra.mxu0 %v38_v33 }
 0x16a   :  { %v173_v34 = vpop.f32.mrf.mxu0 }
 0x16c   :  { %v175_v35 = vpop.f32.mrf.mxu0 }
 0x16d   :  { %v233_v36 = vpack.c.bf16 %v175_v35, %v173_v34 }
 0x16e   :  { %v177_v37 = vpop.f32.mrf.mxu0 }
 0x16f   :  { %209 = vst [vmem:[%s342_s2] sm:$0xff] %v233_v36 }
 0x170   :  { %v179_v38 = vpop.f32.mrf.mxu0 }
 0x171   :  { %v234_v39 = vpack.c.bf16 %v179_v38, %v177_v37 }
 0x173   :  { %210 = vst [vmem:[%s342_s2 + $0x8] sm:$0xff] %v234_v39 }

// kernel: model_forward.16
= control target key start
LH: loop header
LB: loop body
LE: loop exit
PB: predicated region body
PF: predicated region fallthrough
CT: control target
= control target key end

     0   :  { %s3033_s12 = smov 0   ;;  %s3035_s13 = smov 0   ;;  %s3423_s0 = inlined_call_operand.vmem [shape: bf16[2,8,96], index: 0, kind: input, shape index: {}]   ;;  %s3424_s1 = inlined_call_operand.vmem [shape: f32[2,8,4], index: 1, kind: input, shape index: {}]   ;;  %s3425_s2 = inlined_call_operand.vmem [shape: f32[2,2], index: 2, kind: input, shape index: {}]   ;;  %s3426_s3 = inlined_call_operand.vmem [shape: f32[2,8,32], index: 3, kind: output, shape index: {}]  }
   0x1   :  { %s3037_s14 = smov 0  }
   0x2 LB: > { %s25_s15 = sadd.s32 1, %s2992_s13  ;;  %p2633_p0 = scmp.ge.s32.totalorder %s2996_s14, 1  ;;  %s2996_s14 = sphi %s3037_s14, %s13_s14   ;;  %s2992_s13 = sphi %s3035_s13, %s3428_s13   ;;  %s2988_s12 = sphi %s3033_s12, %s3427_s12  }
   0x3   : > { %p27_p1 = scmp.ge.s32.totalorder %s25_s15, 2  ;;  %p169_p2 = scmp.lt.s32.totalorder %s2996_s14, 3 }
   0x5   : > { %s3430_s15 = smov (%p27_p1, %s25_s15), 0  ;;  %p170_p3 = pnand %p2633_p0, %p169_p2 }
   0x6   : > { %p204_p4 = scmp.lt.s32.totalorder (!%p170_p3), %s2988_s12, 1  ;;  %s2998_s18 = smov (!%p170_p3), 2  }
   0x7   : > { %173 = sbr.rel (%p170_p3) target bundleno = 3243 (0xcab), region = 32  ;;  %s2999_s23 = smov (!%p170_p3), 96  }
   0x8   : > { %s3002_s28 = smov (!%p170_p3), 126   ;;  %s3005_s4 = smov (!%p170_p3), 64  }
   0x9   : > { %s3006_s5 = smov (!%p170_p3), 80   ;;  %s3007_s8 = smov (!%p170_p3), 127  }
   0xa   : > { %s3009_s9 = smov (!%p170_p3), 1   ;;  %s3010_s10 = smov (!%p170_p3), 112  }
   0xb   : > { %s3011_s11 = smov (!%p170_p3), 48   ;;  %s3012_s16 = smov (!%p170_p3), 16  }
   0xc   : > { %v3054_v0 = vld [vmem:[%s3425_s2 + $0x1] ss:$0 sm:$0xff]  ;;  %s3432_s12 = smov (!%p204_p4, %s2988_s12), 1  ;;  %vm229_vm0 = vcmask 130048   ;;  %v3000_v16 = vmov 0.0   ;;  %vm3001_vm1 = vmmov 0   ;;  %v234_v25 = vlaneseq }
   0xd   : > { %290 = vrot.lane.b32.xlu0 %v3054_v0, %s2998_s18  ;;  %s2634_s19 = sshll.u32 %s3432_s12, 2  ;;  %s2635_s24 = sshll.u32 %s3432_s12, 3  ;;  %2739 = vmatprep.subr.mxu0 %v3000_v16  ;;  %230 = vst.msk [vmem:[#allocation2] sm:$0xff] %vm229_vm0, %v3000_v16  ;;  %231 = vst.msk [vmem:[#allocation2 + $0x8] sm:$0xff] %vm229_vm0, %v3000_v16  ;;  %v3003_v22 = vmov 0   ;;  %vm311_vm4 = vcmask 64512  }
   0xe   : > { %s3064_s22 = scalar_lea.vmem %s3423_s0, %s2634_s19  ;;  %s217_s27 = scalar_lea.vmem %s3424_s1, %s2635_s24  ;;  %232 = vst.msk [vmem:[#allocation2 + $0x10] sm:$0xff] %vm229_vm0, %v3000_v16  ;;  %233 = vst.msk [vmem:[#allocation2 + $0x18] sm:$0xff] %vm229_vm0, %v3000_v16  ;;  %2744 = vmatprep.subr.mxu1 %v3000_v16  ;;  %2741 = vmatprep.mubr.msk.f32.mxu0 %vm3001_vm1, %v3000_v16  ;;  %v274_v23 = vld [vmem:[%s3425_s2] sm:$0x1]  ;;  %v3105_v26 = vshrl.u32 %v234_v25, 7  ;;  %v3108_v30 = vand.u32 127, %v234_v25 }
   0xf   : > { %v245_v1 = vld [vmem:[%s3064_s22] sm:$0xf]  ;;  %2746 = vmatprep.mubr.msk.f32.mxu1 %vm3001_vm1, %v3000_v16  ;;  %2916 = vset.pattern.permute.xlu0 %v3003_v22  ;;  %v275_v24 = vmul.f32 1.442695, %v274_v23  ;;  %vm385_vm5 = vcmask 7168   ;;  %v3004_v47 = vmov 1.0   ;;  %s224_s19 = scalar_lea.vmem %s3426_s3, %s2635_s24 }
  0x10   : > { %v246_v2 = vunpack.c.l.bf16 %v245_v1  ;;  %v3081_v9 = vld [vmem:[%s217_s27] sm:$0xff]  ;;  %2917 = vset.pattern.permute.xlu1 %v3003_v22  ;;  %v304_v29 = vsub.s32 0, %v3105_v26  ;;  %vm239_vm3 = vcmp.ge.s32.totalorder %v3105_v26, %v3108_v30  ;;  %vm238_vm6 = vcmp.gt.s32.totalorder %v3105_v26, %v3108_v30 }
  0x11   : > { %v3120_v34 = vsel %vm239_vm3, 1.0, %v3000_v16  ;;  %v2640_v39 = vmul.f32 -1.442695, %v3081_v9  ;;  %vm240_vm7 = vcmp.eq.s32.totalorder %v3105_v26, %v3108_v30  ;;  %vm1527_vm9 = vcmask 15368  }
  0x12   : > { %v2639_v3 = vmul.f32 -1.442695, %v246_v2  ;;  %v3176_v63 = vsel %vm240_vm7, 1.0, %v3000_v16  ;;  %vm2538_vm10 = vcmask 261120  }
  0x14   : > { %2922 = vpow2.f32 %v2639_v3  ;;  %v3179_v3 = vld [vmem:[#allocation2 + $0x8] sm:$0xff] }
  0x21   : > { %v2923_v4 = vpop.eup %2922 }
  0x22   : > { %v251_v5 = vadd.f32 1.0, %v2923_v4 }
  0x24   : > { %2924 = vrcp.f32 %v251_v5  ;;  %v3184_v5 = vld [vmem:[#allocation2] sm:$0xff] }
  0x31   : > { %v2925_v6 = vpop.eup %2924 }
  0x32   : > { %v3067_v7 = vmul.f32 %v2925_v6, %v246_v2 }
  0x34   : > { %v3071_v8 = vmul.f32 %v3067_v7, %v3067_v7 }
  0x36   : > { %265 = vrot.lane.b32.xlu1 %v3071_v8, %s2999_s23 }
  0x7f   : > { %v291_v10 = vpop.permute.xlu0 %290 }
  0x80   : > { %v293_v11 = vadd.f32 %v291_v10, %v3081_v9 }
  0x82   : > { %v295_v12 = vmin.f32 %v293_v11, 20.0  ;;  %vm294_vm2 = vcmp.gt.f32.partialorder %v293_v11, 20.0 }
  0x84   : > { %v296_v13 = vmul.f32 1.442695, %v295_v12 }
  0x86   : > { %2926 = vpow2.f32 %v296_v13 }
  0x93   : > { %v2927_v14 = vpop.eup %2926 }
  0x94   : > { %v298_v15 = vadd.f32 1.0, %v2927_v14 }
  0x96   : > { %2928 = vlog2.f32 %v298_v15 }
  0x97   : > { %2930 = vpow2.f32 %v275_v24 }
  0xa3   : > { %v2929_v17 = vpop.eup %2928 }
  0xa4   : > { %v300_v18 = vmul.f32 0.6931472, %v2929_v17  ;;  %v2931_v27 = vpop.eup %2930 }
  0xa5   : > { %v284_v28 = vsub.f32 0.0, %v2931_v27 }
  0xa6   : > { %v301_v19 = vsel %vm294_vm2, %v293_v11, %v300_v18 }
  0xa7   : > { %307 = vrot.lane.b32.xlu0 %v301_v19, %s3002_s28  ;;  %v305_v31 = vrot.slane %v284_v28, %v304_v29  ;;  %v257_v19 = vsel %vm229_vm0, %v3071_v8, 0.0  ;;  %v1385_v8 = vld [vmem:[%s3064_s22] sm:$0xf] }
  0xa8   : > { %v266_v20 = vpop.permute.xlu1 %265 }
  0xa9   : > { %v268_v21 = vsel %vm229_vm0, %v266_v20, 0.0 }
  0xaa   : > { %269 = vadd.xlane.f32.xlu1 %v268_v21 }
 0x119   : > { %v308_v32 = vpop.permute.xlu0 %307 }
 0x11a   : > { %v3114_v33 = vmul.f32 %v308_v32, %v305_v31 }
 0x11c   : > { %2740 = vmatpush3.msra.mxu0 %v3114_v33 }
 0x11d   : > { %2742 = vmatmul.mubr.msk.f32.vlgmr.msra.gmra.mxu0 %vm311_vm4, %v3120_v34  ;;  %2749 = vmatprep.subr.mxu0 %v3000_v16 }
 0x11e   : > { %2751 = vmatprep.mubr.msk.f32.mxu0 %vm3001_vm1, %v3000_v16 }
 0x133   : > { %v270_v35 = vpop.xlane.xlu1 %269 }
 0x134   : > { %v271_v36 = vadd.f32 1e-06, %v270_v35 }
 0x136   : > { %2932 = vrsqrt.f32 %v271_v36  ;;  %v1386_v36 = vunpack.c.l.bf16 %v1385_v8 }
 0x137   : > { %2934 = vpow2.f32 %v2640_v39 }
 0x143   : > { %v2933_v37 = vpop.eup %2932 }
 0x144   : > { %v3129_v38 = vmul.f32 %v2933_v37, %v3067_v7  ;;  %v2935_v41 = vpop.eup %2934 }
 0x145   : > { %v281_v42 = vadd.f32 1.0, %v2935_v41  ;;  %v2659_v41 = vmul.f32 -1.442695, %v1386_v36 }
 0x146   : > { %489 = vrot.lane.b32.xlu0 %v3129_v38, %s2999_s23 }
 0x147   : > { %2936 = vrcp.f32 %v281_v42 }
 0x154   : > { %v3149_v45 = vpop.eup %2936 }
 0x1b8   : > { %v3134_v40 = vpop.permute.xlu0 %489 }
 0x1b9   : > { %2750 = vmatpush3.xpose.msk.msra.mxu0 %vm229_vm0, %v3134_v40 }
 0x1ba   : > { %2759 = vmatprep.subr.mxu0 %v3000_v16 }
 0x1bc   : > { %2752 = vmatmul.mubr.msk.f32.vlgmr.msra.gmra.mxu0 %vm229_vm0, %v3134_v40 }
 0x1bd   : > { %2761 = vmatprep.mubr.msk.f32.mxu0 %vm3001_vm1, %v3000_v16 }
 0x1dd   : > { %v3143_v43 = vpop.f32.mrf.mxu0 }
 0x1de   : > { %v861_v44 = vmul.f32 1.442695, %v3143_v43  ;;  %2745 = vmatpush3.xpose.msk.msra.mxu1 %vm385_vm5, %v3143_v43  ;;  %470 = vperm.xlu0 %2916, %v3143_v43  }
 0x1df   : > { %v2743_v46 = vpop.f32.mrf.mxu0  ;;  %2754 = vmatprep.subr.mxu1 %v3000_v16 }
 0x1e0   : > { %2938 = vpow2.f32 %v861_v44 }
 0x1e1   : > { %2747 = vmatmul.mubr.msk.f32.vlgmr.msra.gmra.mxu1 %vm385_vm5, %v3004_v47 }
 0x1e2   : > { %484 = vperm.xlu0 %2916, %v3149_v45   ;;  %2756 = vmatprep.mubr.msk.f32.mxu1 %vm3001_vm1, %v3000_v16 }
 0x1ed   : > { %v3157_v48 = vpop.eup %2938 }
 0x1ee   : > { %v863_v49 = vmul.f32 %v3157_v48, %v3149_v45 }
 0x1f0   : > { %936 = vperm.xlu0 %2916, %v863_v49  }
 0x259   : > { %v471_v52 = vpop.permute.xlu0 %470 }
 0x25d   : > { %v485_v59 = vpop.permute.xlu0 %484 }
 0x25e   : > { %v860_v20 = vmul.f32 %v485_v59, %v3067_v7 }
 0x26b   : > { %v937_v14 = vpop.permute.xlu0 %936 }
 0x27c   : > { %v559_v50 = vpop.f32.mrf.mxu0 }
 0x27e   : > { %v2753_v51 = vpop.f32.mrf.mxu0 }
 0x2a1   : > { %v465_v53 = vpop.f32.mrf.mxu1 }
 0x2a2   : > { %v3163_v54 = vsub.f32 %v471_v52, %v465_v53 }
 0x2a3   : > { %v2748_v55 = vpop.f32.mrf.mxu1 }
 0x2a4   : > { %v477_v56 = vsel %vm238_vm6, %v3163_v54, -1e+30 }
 0x2a5   : > { %v478_v57 = vmul.f32 1.442695, %v477_v56 }
 0x2a7   : > { %2940 = vpow2.f32 %v478_v57 }
 0x2b4   : > { %v2941_v58 = vpop.eup %2940 }
 0x2b5   : > { %v487_v60 = vmul.f32 %v2941_v58, %v485_v59 }
 0x2b7   : > { %v563_v61 = vmul.f32 %v559_v50, %v487_v60 }
 0x2b9   : > { %v564_v62 = vsub.f32 0.0, %v563_v61 }
 0x2bb   : > { %2755 = vmatpush3.msra.mxu1 %v564_v62  ;;  %v565_v1 = vadd.f32 %v3176_v63, %v564_v62 }
 0x2bc   : > { %2757 = vmatmul.mubr.msk.f32.vlgmr.msra.gmra.mxu1 %vm311_vm4, %v564_v62  ;;  %2764 = vmatprep.subr.mxu1 %v3000_v16 }
 0x2bd   : > { %2766 = vmatprep.mubr.msk.f32.mxu1 %vm3001_vm1, %v3000_v16 }
 0x37c   : > { %v635_v2 = vpop.f32.mrf.mxu1 }
 0x37d   : > { %2760 = vmatpush3.msra.mxu0 %v635_v2  ;;  %2765 = vmatpush3.msra.mxu1 %v635_v2 }
 0x37e   : > { %v2758_v4 = vpop.f32.mrf.mxu1  ;;  %2762 = vmatmul.mubr.msk.f32.vlgmr.msra.gmra.mxu0 %vm311_vm4, %v565_v1  ;;  %2767 = vmatmul.mubr.msk.f32.vlgmr.msra.gmra.mxu1 %vm311_vm4, %v635_v2 }
 0x37f   : > { %2774 = vmatprep.subr.mxu1 %v3000_v16  ;;  %2778 = vmatprep.mubr.msk.f32.mxu1 %vm3001_vm1, %v3000_v16  ;;  %v1416_v4 = vld [vmem:[%s3425_s2] sm:$0x1] }
 0x380   : > { %2775 = vmatpush3.msra.mxu1 %v3179_v3  ;;  %2769 = vmatprep.subr.mxu0 %v3000_v16 }
 0x381   : > { %2776 = vmatprep.subr.mxu1 %v3000_v16  ;;  %2771 = vmatprep.mubr.msk.f32.mxu0 %vm3001_vm1, %v3000_v16 }
 0x382   : > { %2777 = vmatpush3.msra.mxu1 %v3184_v5 }
 0x383   : > { %2779 = vmatmul.mubr.msk.f32.vlgmr.msra.gmra.mxu1 %vm229_vm0, %v3134_v40  ;;  %2786 = vmatprep.subr.mxu1 %v3000_v16 }
 0x384   : > { %2787 = vmatpush3.msra.mxu1 %v3179_v3  ;;  %2790 = vmatprep.mubr.msk.f32.mxu1 %vm3001_vm1, %v3000_v16 }
 0x385   : > { %2788 = vmatprep.subr.mxu1 %v3000_v16 }
 0x386   : > { %2789 = vmatpush3.msra.mxu1 %v3184_v5 }
 0x387   : > { %2798 = vmatprep.subr.mxu1 %v3000_v16 }
 0x43e   : > { %v708_v6 = vpop.f32.mrf.mxu0  ;;  %v782_v10 = vpop.f32.mrf.mxu1 }
 0x43f   : > { %v712_v11 = vadd.f32 %v708_v6, %v565_v1  ;;  %2770 = vmatpush3.msra.mxu0 %v782_v10  ;;  %v1417_v6 = vmul.f32 1.442695, %v1416_v4 }
 0x440   : > { %v2763_v12 = vpop.f32.mrf.mxu0  ;;  %v2768_v13 = vpop.f32.mrf.mxu1  ;;  %2781 = vmatprep.subr.mxu0 %v3000_v16 }
 0x441   : > { %2772 = vmatmul.mubr.msk.f32.vlgmr.msra.gmra.mxu0 %vm311_vm4, %v712_v11 }
 0x442   : > { %2783 = vmatprep.mubr.msk.f32.mxu0 %vm3001_vm1, %v3000_v16 }
 0x443   : > { %v930_v15 = vpop.f32.mrf.mxu1 }
 0x444   : > { %v939_v17 = vmul.f32 %v937_v14, %v930_v15 }
 0x445   : > { %v2780_v18 = vpop.f32.mrf.mxu1 }
 0x446   : > { %941 = vrot.lane.b32.xlu0 %v939_v17, %s3005_s4 }
 0x465   : > { %258 = vadd.xlane.f32.xlu0 %v257_v19 }
 0x4b8   : > { %v942_v21 = vpop.permute.xlu0 %941 }
 0x4b9   : > { %v944_v23 = vsub.f32 %v860_v20, %v942_v21 }
 0x4bb   : > { %946 = vrot.lane.b32.xlu1 %v944_v23, %s3005_s4  ;;  %v474_v23 = vsel %vm239_vm3, %v3163_v54, -1e+30 }
 0x4bf   : > { %1432 = vrot.lane.b32.xlu1 %v3054_v0, %s2998_s18 }
 0x4ee   : > { %v259_v24 = vpop.xlane.xlu0 %258 }
 0x4ef   : > { %v260_v25 = vadd.f32 1e-06, %v259_v24 }
 0x4f1   : > { %2942 = vrsqrt.f32 %v260_v25 }
 0x4f2   : > { %2944 = vpow2.f32 %v2659_v41 }
 0x4fe   : > { %v2943_v27 = vpop.eup %2942 }
 0x4ff   : > { %v262_v28 = vmul.f32 %v2943_v27, %v3067_v7  ;;  %v386_v7 = vsel %vm385_vm5, %v3114_v33, 0.0  ;;  %v2945_v52 = vpop.eup %2944 }
 0x500   : > { %v387_v46 = vrot.slane %v386_v7, 4  ;;  %v1391_v53 = vadd.f32 1.0, %v2945_v52 }
 0x501   : > { %v855_v31 = vpop.f32.mrf.mxu0  ;;  %v263_v32 = vmul.f32 0.25, %v262_v28 }
 0x502   : > { %v859_v37 = vadd.f32 %v855_v31, %v712_v11  ;;  %v388_v50 = vadd.f32 %v387_v46, %v386_v7 }
 0x503   : > { %v2773_v35 = vpop.f32.mrf.mxu0  ;;  %2791 = vmatmul.mubr.msk.f32.vlgmr.msra.gmra.mxu1 %vm229_vm0, %v263_v32 }
 0x504   : > { %2800 = vmatprep.mubr.msk.f32.mxu1 %vm3001_vm1, %v3000_v16  ;;  %v389_v51 = vrot.slane %v388_v50, 2 }
 0x52d   : > { %v947_v39 = vpop.permute.xlu1 %946 }
 0x52e   : > { %2782 = vmatpush3.msra.mxu0 %v947_v39  ;;  %v3008_v39 = vmov 1  }
 0x52f   : > { %2784 = vmatmul.mubr.msk.f32.vlgmr.msra.gmra.mxu0 %vm311_vm4, %v859_v37  ;;  %2793 = vmatprep.subr.mxu0 %v3000_v16 }
 0x530   : > { %2794 = vmatpush3.xpose.msk.msra.mxu0 %vm229_vm0, %v3134_v40  ;;  %2795 = vmatprep.mubr.msk.f32.mxu0 %vm3001_vm1, %v3000_v16  ;;  %v390_v40 = vadd.f32 %v389_v51, %v388_v50 }
 0x531   : > { %v1433_v0 = vpop.permute.xlu1 %1432 }
 0x532   : > { %v1435_v42 = vadd.f32 %v1433_v0, %v3081_v9  ;;  %v391_v56 = vrot.slane %v390_v40, 1 }
 0x533   : > { %2796 = vmatmul.mubr.msk.f32.vlgmr.msra.gmra.mxu0 %vm229_vm0, %v263_v32 }
 0x534   : > { %v1437_v44 = vmin.f32 %v1435_v42, 20.0  ;;  %v3227_v58 = vadd.f32 %v391_v56, %v390_v40  ;;  %vm1436_vm8 = vcmp.gt.f32.partialorder %v1435_v42, 20.0 }
 0x536   : > { %v1438_v49 = vmul.f32 1.442695, %v1437_v44  ;;  %v1246_v9 = vsub.f32 %v3227_v58, %v3143_v43 }
 0x538   : > { %2946 = vpow2.f32 %v1438_v49  ;;  %v1247_v33 = vmul.f32 1.442695, %v1246_v9 }
 0x539   : > { %2948 = vrcp.f32 %v1391_v53 }
 0x545   : > { %v2947_v55 = vpop.eup %2946 }
 0x546   : > { %v1440_v57 = vadd.f32 1.0, %v2947_v55  ;;  %v2949_v59 = vpop.eup %2948 }
 0x547   : > { %v3231_v61 = vmul.f32 %v2949_v59, %v1386_v36 }
 0x548   : > { %2950 = vlog2.f32 %v1440_v57 }
 0x549   : > { %2952 = vpow2.f32 %v1247_v33  ;;  %v3236_v2 = vmul.f32 %v3231_v61, %v3231_v61 }
 0x54a   : > { %2954 = vpow2.f32 %v1417_v6 }
 0x555   : > { %v2951_v60 = vpop.eup %2950 }
 0x556   : > { %v1442_v62 = vmul.f32 0.6931472, %v2951_v60  ;;  %v2953_v43 = vpop.eup %2952 }
 0x557   : > { %v2955_v10 = vpop.eup %2954 }
 0x558   : > { %v1443_v1 = vsel %vm1436_vm8, %v1435_v42, %v1442_v62  ;;  %v1426_v12 = vsub.f32 0.0, %v2955_v10 }
 0x559   : > { %1449 = vrot.lane.b32.xlu1 %v1443_v1, %s3002_s28 }
 0x55a   : > { %v1447_v14 = vrot.slane %v1426_v12, %v304_v29  ;;  %v475_v29 = vmul.f32 1.442695, %v474_v23 }
 0x55c   : > { %2956 = vpow2.f32 %v475_v29 }
 0x55d   : > { %1407 = vrot.lane.b32.xlu1 %v3236_v2, %s3006_s5 }
 0x561   : > { %1251 = vperm.xlu1 %2917, %v2953_v43  }
 0x569   : > { %v2957_v27 = vpop.eup %2956 }
 0x5c3   : > { %v3243_v11 = vpop.f32.mrf.mxu1 }
 0x5c5   : > { %v2792_v13 = vpop.f32.mrf.mxu1 }
 0x5cb   : > { %v1450_v15 = vpop.permute.xlu1 %1449 }
 0x5cc   : > { %v3247_v17 = vmul.f32 %v1450_v15, %v1447_v14 }
 0x5ce   : > { %1454 = vrot.lane.b32.xlu0 %v3247_v17, %s3007_s8  ;;  %v1528_v6 = vsel %vm1527_vm9, %v3247_v17, 0.0 }
 0x5cf   : > { %v1408_v18 = vpop.permute.xlu1 %1407  ;;  %v1529_v10 = vrot.slane %v1528_v6, 4 }
 0x5d0   : > { %v1410_v19 = vsel %vm229_vm0, %v1408_v18, 0.0 }
 0x5d1   : > { %1411 = vadd.xlane.f32.xlu1 %v1410_v19  ;;  %v1530_v13 = vadd.f32 %v1529_v10, %v1528_v6 }
 0x5d3   : > { %v1531_v18 = vrot.slane %v1530_v13, 2 }
 0x5d5   : > { %v1532_v19 = vadd.f32 %v1531_v18, %v1530_v13 }
 0x5dc   : > { %v1252_v20 = vpop.permute.xlu1 %1251 }
 0x5dd   : > { %v1254_v21 = vmul.f32 %v1252_v20, %v3129_v38  ;;  %v1533_v20 = vrot.slane %v1532_v19, 1 }
 0x5df   : > { %1265 = vrot.lane.b32.xlu0 %v1254_v21, %s2999_s23  ;;  %v1255_v21 = vmul.f32 1.442695, %v3227_v58  ;;  %v3328_v29 = vadd.f32 %v1533_v20, %v1532_v19 }
 0x5e1   : > { %v2403_v17 = vmul.f32 1.442695, %v3328_v29 }
 0x5ef   : > { %v1018_v24 = vpop.f32.mrf.mxu0 }
 0x5f0   : > { %2799 = vmatpush3.msra.mxu1 %v1018_v24  ;;  %2803 = vmatprep.subr.mxu0 %v1018_v24 }
 0x5f1   : > { %v2785_v25 = vpop.f32.mrf.mxu0  ;;  %2804 = vmatpush3.msra.mxu0 %v1018_v24  ;;  %2808 = vmatprep.subr.mxu1 %v3000_v16 }
 0x5f2   : > { %2813 = vmatprep.subr.mxu0 %v3000_v16 }
 0x5f3   : > { %v1167_v38 = vpop.f32.mrf.mxu0 }
 0x5f4   : > { %v1171_v28 = vmul.f32 %v2957_v27, %v1167_v38 }
 0x5f5   : > { %v2797_v31 = vpop.f32.mrf.mxu0 }
 0x5f6   : > { %2801 = vmatmul.mubr.msk.f32.vlgmr.msra.gmra.mxu1 %vm311_vm4, %v1171_v28  ;;  %v3336_v31 = vld [vmem:[#allocation2 + $0x18] sm:$0xff] }
 0x5f7   : > { %2810 = vmatprep.mubr.msk.f32.mxu1 %vm3001_vm1, %v3000_v16 }
 0x640   : > { %v1455_v54 = vpop.permute.xlu0 %1454 }
 0x641   : > { %2809 = vmatpush3.msra.mxu1 %v1455_v54 }
 0x642   : > { %2811 = vmatmul.mubr.msk.f32.vlgmr.msra.gmra.mxu1 %vm311_vm4, %v3120_v34  ;;  %2818 = vmatprep.subr.mxu1 %v3000_v16 }
 0x643   : > { %2820 = vmatprep.mubr.msk.f32.mxu1 %vm3001_vm1, %v3000_v16 }
 0x651   : > { %v1266_v37 = vpop.permute.xlu0 %1265 }
 0x65a   : > { %v1412_v32 = vpop.xlane.xlu1 %1411 }
 0x65b   : > { %v1413_v35 = vadd.f32 1e-06, %v1412_v32 }
 0x65d   : > { %2958 = vrsqrt.f32 %v1413_v35 }
 0x66a   : > { %v2959_v8 = vpop.eup %2958 }
 0x66b   : > { %v3268_v36 = vmul.f32 %v2959_v8, %v3231_v61 }
 0x66d   : > { %1629 = vrot.lane.b32.xlu0 %v3268_v36, %s3006_s5 }
 0x68b   : > { %1268 = vxpose.xlu0.b32.start.end [1/1] (short) (narrow) %v1266_v37, 16 }
 0x6b4   : > { %2918 = vset.pattern.permute.xlu0 %v3008_v39 }
 0x6b6   : > { %v3273_v34 = vpop.f32.mrf.mxu1 }
 0x6b8   : > { %v2802_v41 = vpop.f32.mrf.mxu1  ;;  %1624 = vperm.xlu0 %2918, %v3149_v45  }
 0x6df   : > { %v3276_v0 = vpop.permute.xlu0 %1629 }
 0x6e0   : > { %2819 = vmatpush3.xpose.msk.msra.mxu1 %vm229_vm0, %v3276_v0 }
 0x6e1   : > { %2828 = vmatprep.subr.mxu1 %v3000_v16 }
 0x6e3   : > { %2821 = vmatmul.mubr.msk.f32.vlgmr.msra.gmra.mxu1 %vm229_vm0, %v3276_v0 }
 0x6e4   : > { %2830 = vmatprep.mubr.msk.f32.mxu1 %vm3001_vm1, %v3000_v16 }
 0x702   : > { %v3285_v7 = vpop.f32.mrf.mxu1 }
 0x703   : > { %v2001_v42 = vmul.f32 1.442695, %v3285_v7  ;;  %1609 = vperm.xlu1 %2917, %v3285_v7  }
 0x704   : > { %v2812_v44 = vpop.f32.mrf.mxu1 }
 0x705   : > { %2960 = vpow2.f32 %v2001_v42 }
 0x707   : > { %v1284_v46 = vpop.trf.xlu0  ;;  %2919 = vset.pattern.permute.xlu1 %v3008_v39 }
 0x708   : > { %2805 = vmatprep.mubr.msk.f32.mxu0 %vm311_vm4, %v1284_v46 }
 0x70b   : > { %v1285_v49 = vpop.trf.xlu0 }
 0x70c   : > { %2806 = vmatmul.mubr.msk.f32.vlgmr.msra.gmra.mxu0 %vm311_vm4, %v1285_v49 }
 0x70d   : > { %2814 = vmatpush3.xpose.msk.msra.mxu0 %vm385_vm5, %v3285_v7  ;;  %2815 = vmatprep.mubr.msk.f32.mxu0 %vm3001_vm1, %v3000_v16 }
 0x70e   : > { %2823 = vmatprep.subr.mxu0 %v3000_v16 }
 0x710   : > { %2816 = vmatmul.mubr.msk.f32.vlgmr.msra.gmra.mxu0 %vm385_vm5, %v3004_v47 }
 0x711   : > { %2825 = vmatprep.mubr.msk.f32.mxu0 %vm3001_vm1, %v3000_v16 }
 0x712   : > { %v2961_v50 = vpop.eup %2960 }
 0x713   : > { %2004 = vrot.lane.b32.xlu1 %v2961_v50, %s3009_s9 }
 0x717   : > { %1397 = vrot.lane.b32.xlu1 %v3236_v2, %s3010_s10 }
 0x733   : > { %v3317_v62 = vpop.permute.xlu0 %1624 }
 0x77e   : > { %v1610_v51 = vpop.permute.xlu1 %1609 }
 0x785   : > { %v2005_v52 = vpop.permute.xlu1 %2004 }
 0x786   : > { %v2007_v40 = vmul.f32 %v3149_v45, %v2005_v52 }
 0x788   : > { %2080 = vperm.xlu1 %2919, %v2007_v40  }
 0x789   : > { %v1398_v55 = vpop.permute.xlu1 %1397 }
 0x78a   : > { %v1400_v56 = vsel %vm229_vm0, %v1398_v55, 0.0 }
 0x78c   : > { %2920 = vset.pattern.permute.xlu1 %v3003_v22 }
 0x7a3   : > { %v1699_v53 = vpop.f32.mrf.mxu1 }
 0x7a5   : > { %v2822_v47 = vpop.f32.mrf.mxu1 }
 0x7a6   : > { %v2000_v47 = vmul.f32 %v3317_v62, %v3231_v61 }
 0x7ac   : > { %1401 = vadd.xlane.f32.xlu1 %v1400_v56 }
 0x7cc   : > { %v3307_v57 = vpop.f32.mrf.mxu0 }
 0x7ce   : > { %v3309_v9 = vpop.f32.mrf.mxu0 }
 0x7d0   : > { %v1604_v33 = vpop.f32.mrf.mxu0 }
 0x7d1   : > { %v3311_v59 = vsub.f32 %v1610_v51, %v1604_v33 }
 0x7d2   : > { %v2817_v60 = vpop.f32.mrf.mxu0 }
 0x7d3   : > { %v1616_v45 = vsel %vm238_vm6, %v3311_v59, -1e+30 }
 0x7d4   : > { %v1617_v22 = vmul.f32 1.442695, %v1616_v45 }
 0x7d6   : > { %2962 = vpow2.f32 %v1617_v22 }
 0x7e3   : > { %v2963_v1 = vpop.eup %2962 }
 0x7e4   : > { %v1627_v2 = vmul.f32 %v2963_v1, %v3317_v62 }
 0x7e6   : > { %v1703_v43 = vmul.f32 %v1699_v53, %v1627_v2 }
 0x7e8   : > { %v1704_v4 = vsub.f32 0.0, %v1703_v43 }
 0x7ea   : > { %2824 = vmatpush3.msra.mxu0 %v1704_v4  ;;  %v1705_v58 = vadd.f32 %v3176_v63, %v1704_v4 }
 0x7eb   : > { %2826 = vmatmul.mubr.msk.f32.vlgmr.msra.gmra.mxu0 %vm311_vm4, %v1704_v4  ;;  %2833 = vmatprep.subr.mxu0 %v3000_v16 }
 0x7ec   : > { %2835 = vmatprep.mubr.msk.f32.mxu0 %vm3001_vm1, %v3000_v16 }
 0x803   : > { %v3325_v12 = vpop.permute.xlu1 %2080 }
 0x835   : > { %v1402_v14 = vpop.xlane.xlu1 %1401 }
 0x836   : > { %v1403_v15 = vadd.f32 1e-06, %v1402_v14 }
 0x838   : > { %2964 = vrsqrt.f32 %v1403_v15 }
 0x839   : > { %2966 = vpow2.f32 %v1255_v21 }
 0x83a   : > { %2968 = vpow2.f32 %v2403_v17 }
 0x845   : > { %v2965_v23 = vpop.eup %2964 }
 0x846   : > { %v1405_v24 = vmul.f32 %v2965_v23, %v3231_v61  ;;  %v2967_v27 = vpop.eup %2966 }
 0x847   : > { %v2969_v38 = vpop.eup %2968 }
 0x848   : > { %v1406_v25 = vmul.f32 0.25, %v1405_v24 }
 0x84a   : > { %2167 = vrot.lane.b32.xlu1 %v1406_v25, %s3010_s10 }
 0x84e   : > { %2242 = vperm.xlu1 %2920, %v2961_v50  }
 0x852   : > { %1097 = vperm.xlu1 %2920, %v3157_v48   ;;  %v3341_v48 = vld [vmem:[#allocation2 + $0x10] sm:$0xff] }
 0x856   : > { %1259 = vperm.xlu1 %2920, %v2967_v27  }
 0x85a   : > { %2921 = vset.pattern.permute.xlu1 %v3008_v39 }
 0x85b   : > { %2407 = vperm.xlu1 %2921, %v2969_v38  }
 0x8ab   : > { %v1775_v28 = vpop.f32.mrf.mxu0 }
 0x8ac   : > { %2829 = vmatpush3.msra.mxu1 %v1775_v28  ;;  %2834 = vmatpush3.msra.mxu0 %v1775_v28 }
 0x8ad   : > { %v2827_v54 = vpop.f32.mrf.mxu0  ;;  %2831 = vmatmul.mubr.msk.f32.vlgmr.msra.gmra.mxu1 %vm311_vm4, %v1705_v58  ;;  %2836 = vmatmul.mubr.msk.f32.vlgmr.msra.gmra.mxu0 %vm311_vm4, %v1775_v28 }
 0x8ae   : > { %2843 = vmatprep.subr.mxu0 %v3000_v16  ;;  %2847 = vmatprep.mubr.msk.f32.mxu0 %vm3001_vm1, %v3000_v16 }
 0x8af   : > { %2844 = vmatpush3.msra.mxu0 %v3336_v31  ;;  %2838 = vmatprep.subr.mxu1 %v3000_v16 }
 0x8b0   : > { %2845 = vmatprep.subr.mxu0 %v3000_v16  ;;  %2840 = vmatprep.mubr.msk.f32.mxu1 %vm3001_vm1, %v3000_v16 }
 0x8b1   : > { %2846 = vmatpush3.msra.mxu0 %v3341_v48 }
 0x8b2   : > { %2848 = vmatmul.mubr.msk.f32.vlgmr.msra.gmra.mxu0 %vm229_vm0, %v3276_v0  ;;  %2855 = vmatprep.subr.mxu0 %v3000_v16 }
 0x8b3   : > { %2856 = vmatpush3.msra.mxu0 %v3336_v31  ;;  %2859 = vmatprep.mubr.msk.f32.mxu0 %vm3001_vm1, %v3000_v16 }
 0x8b4   : > { %2857 = vmatprep.subr.mxu0 %v3000_v16 }
 0x8b5   : > { %2858 = vmatpush3.msra.mxu0 %v3341_v48 }
 0x8b6   : > { %2867 = vmatprep.subr.mxu0 %v3000_v16 }
 0x8bc   : > { %v2168_v63 = vpop.permute.xlu1 %2167 }
 0x8bd   : > { %2860 = vmatmul.mubr.msk.f32.vlgmr.msra.gmra.mxu0 %vm229_vm0, %v2168_v63 }
 0x8be   : > { %2869 = vmatprep.mubr.msk.f32.mxu0 %vm3001_vm1, %v3000_v16 }
 0x8c9   : > { %v3363_v32 = vpop.permute.xlu1 %2242 }
 0x8cd   : > { %v3365_v35 = vpop.permute.xlu1 %1097 }
 0x8ce   : > { %v1100_v18 = vmul.f32 %v3365_v35, %v3243_v11 }
 0x8d0   : > { %v1245_v20 = vadd.f32 %v3273_v34, %v1100_v18 }
 0x8d1   : > { %v1260_v8 = vpop.permute.xlu1 %1259 }
 0x8d2   : > { %v1262_v37 = vmul.f32 %v1260_v8, %v3184_v5  ;;  %v1263_v39 = vmul.f32 %v1260_v8, %v3179_v3 }
 0x8d4   : > { %v1381_v41 = vadd.f32 %v3309_v9, %v1262_v37  ;;  %v1382_v42 = vadd.f32 %v3307_v57, %v1263_v39 }
 0x8d6   : > { %1383 = vst.msk [vmem:[#allocation2] sm:$0xff] %vm229_vm0, %v1381_v41  ;;  %1384 = vst.msk [vmem:[#allocation2 + $0x8] sm:$0xff] %vm229_vm0, %v1382_v42  ;;  %v2408_v19 = vpop.permute.xlu1 %2407 }
 0x8d7   : > { %v2410_v25 = vmul.f32 %v2408_v19, %v3341_v48 }
 0x96d   : > { %v1848_v44 = vpop.f32.mrf.mxu1  ;;  %v1922_v46 = vpop.f32.mrf.mxu0 }
 0x96e   : > { %v1852_v49 = vadd.f32 %v1848_v44, %v1705_v58  ;;  %2839 = vmatpush3.msra.mxu1 %v1922_v46 }
 0x96f   : > { %v2832_v50 = vpop.f32.mrf.mxu1  ;;  %v2837_v51 = vpop.f32.mrf.mxu0  ;;  %2850 = vmatprep.subr.mxu1 %v3000_v16 }
 0x970   : > { %2841 = vmatmul.mubr.msk.f32.vlgmr.msra.gmra.mxu1 %vm311_vm4, %v1852_v49 }
 0x971   : > { %2852 = vmatprep.mubr.msk.f32.mxu1 %vm3001_vm1, %v3000_v16 }
 0x972   : > { %v2074_v3 = vpop.f32.mrf.mxu0 }
 0x973   : > { %v2083_v5 = vmul.f32 %v3325_v12, %v2074_v3 }
 0x974   : > { %v2849_v52 = vpop.f32.mrf.mxu0 }
 0x975   : > { %2085 = vrot.lane.b32.xlu0 %v2083_v5, %s3006_s5 }
 0x97d   : > { %v2237_v40 = vpop.f32.mrf.mxu0 }
 0x97e   : > { %v2245_v26 = vmul.f32 %v3363_v32, %v2237_v40 }
 0x97f   : > { %v2861_v53 = vpop.f32.mrf.mxu0 }
 0x9e7   : > { %v2086_v55 = vpop.permute.xlu0 %2085 }
 0x9e8   : > { %v2088_v56 = vsub.f32 %v2000_v47, %v2086_v55 }
 0x9ea   : > { %2090 = vrot.lane.b32.xlu0 %v2088_v56, %s3011_s11 }
 0x9ee   : > { %2391 = vrot.lane.b32.xlu0 %v3285_v7, %s3009_s9 }
 0xa30   : > { %v1995_v57 = vpop.f32.mrf.mxu1 }
 0xa31   : > { %v1999_v33 = vadd.f32 %v1995_v57, %v1852_v49 }
 0xa32   : > { %v2842_v9 = vpop.f32.mrf.mxu1 }
 0xa5c   : > { %v2091_v60 = vpop.permute.xlu0 %2090 }
 0xa5d   : > { %2851 = vmatpush3.msra.mxu1 %v2091_v60 }
 0xa5e   : > { %2853 = vmatmul.mubr.msk.f32.vlgmr.msra.gmra.mxu1 %vm311_vm4, %v1999_v33  ;;  %2862 = vmatprep.subr.mxu1 %v3000_v16 }
 0xa5f   : > { %2863 = vmatpush3.xpose.msk.msra.mxu1 %vm229_vm0, %v3276_v0  ;;  %2864 = vmatprep.mubr.msk.f32.mxu1 %vm3001_vm1, %v3000_v16  ;;  %v1613_v0 = vsel %vm239_vm3, %v3311_v59, -1e+30 }
 0xa60   : > { %v2392_v61 = vpop.permute.xlu0 %2391  ;;  %v1614_v16 = vmul.f32 1.442695, %v1613_v0 }
 0xa61   : > { %v2394_v45 = vsub.f32 %v3328_v29, %v2392_v61  ;;  %v2411_v29 = vmul.f32 %v2408_v19, %v3336_v31 }
 0xa62   : > { %2865 = vmatmul.mubr.msk.f32.vlgmr.msra.gmra.mxu1 %vm229_vm0, %v2168_v63 }
 0xa63   : > { %v2395_v7 = vmul.f32 1.442695, %v2394_v45 }
 0xa65   : > { %2970 = vpow2.f32 %v2395_v7 }
 0xa66   : > { %2972 = vpow2.f32 %v1614_v16 }
 0xa72   : > { %v2971_v22 = vpop.eup %2970 }
 0xa73   : > { %2399 = vperm.xlu0 %2918, %v2971_v22   ;;  %v2973_v4 = vpop.eup %2972 }
 0xaee   : > { %v2400_v62 = vpop.permute.xlu0 %2399 }
 0xaef   : > { %v2402_v1 = vmul.f32 %v2400_v62, %v3268_v36 }
 0xaf1   : > { %2413 = vrot.lane.b32.xlu0 %v2402_v1, %s3006_s5 }
 0xb1e   : > { %v2162_v2 = vpop.f32.mrf.mxu1 }
 0xb1f   : > { %2868 = vmatpush3.msra.mxu0 %v2162_v2  ;;  %2872 = vmatprep.subr.mxu1 %v2162_v2 }
 0xb20   : > { %v2854_v43 = vpop.f32.mrf.mxu1  ;;  %2873 = vmatpush3.msra.mxu1 %v2162_v2 }
 0xb22   : > { %v2312_v6 = vpop.f32.mrf.mxu1 }
 0xb23   : > { %v2316_v10 = vmul.f32 %v2973_v4, %v2312_v6 }
 0xb24   : > { %v2866_v12 = vpop.f32.mrf.mxu1 }
 0xb25   : > { %2870 = vmatmul.mubr.msk.f32.vlgmr.msra.gmra.mxu0 %vm311_vm4, %v2316_v10 }
 0xb63   : > { %v2414_v36 = vpop.permute.xlu0 %2413 }
 0xb64   : > { %2416 = vxpose.xlu0.b32.start.end [1/1] (short) (narrow) %v2414_v36, 16 }
 0xbe0   : > { %v2432_v13 = vpop.trf.xlu0 }
 0xbe1   : > { %2874 = vmatprep.mubr.msk.f32.mxu1 %vm311_vm4, %v2432_v13 }
 0xbe4   : > { %v2433_v30 = vpop.trf.xlu0 }
 0xbe5   : > { %v2386_v59 = vpop.f32.mrf.mxu0  ;;  %2875 = vmatmul.mubr.msk.f32.vlgmr.msra.gmra.mxu1 %vm311_vm4, %v2433_v30 }
 0xbe6   : > { %v2390_v14 = vadd.f32 %v2386_v59, %v2245_v26 }
 0xbe7   : > { %v2871_v15 = vpop.f32.mrf.mxu0 }
 0xbe8   : > { %2534 = vrot.lane.b32.xlu1 %v2390_v14, %s3012_s16 }
 0xc5a   : > { %v2535_v21 = vpop.permute.xlu1 %2534 }
 0xc5b   : > { %v2537_v23 = vsel %vm229_vm0, %v1245_v20, %v2535_v21 }
 0xc5c   : > { %2539 = vst.msk [vmem:[%s224_s19] sm:$0xff] %vm2538_vm10, %v2537_v23 }
 0xca5   : > { %v2876_v24 = vpop.f32.mrf.mxu1 }
 0xca6   : > { %v2530_v17 = vadd.f32 %v2876_v24, %v2411_v29 }
 0xca7   : > { %v2520_v11 = vpop.f32.mrf.mxu1 }
 0xca8   : > { %2532 = vst.msk [vmem:[#allocation2 + $0x18] sm:$0xff] %vm229_vm0, %v2530_v17  ;;  %v2529_v27 = vadd.f32 %v2520_v11, %v2410_v25 }
 0xcaa   : > { %2531 = vst.msk [vmem:[#allocation2 + $0x10] sm:$0xff] %vm229_vm0, %v2529_v27 }
 0xcab PF: > { %s13_s14 = sadd.s32 1, %s2996_s14   ;;  %s3427_s12 = smov %s2992_s13 }
 0xcac   : > { %p10_p5 = scmp.ge.s32.totalorder %s13_s14, 4   ;;  %s3428_s13 = smov %s3430_s15 }
 0xcae   :  { %12 = sbr.rel (!%p10_p5) target bundleno = 2 (0x2), region = 70 }

// kernel: model_forward.25
= control target key start
LH: loop header
LB: loop body
LE: loop exit
PB: predicated region body
PF: predicated region fallthrough
CT: control target
= control target key end

     0   :  { %v231_v2 = vmov 0.0   ;;  %vm232_vm0 = vmmov 0   ;;  %s281_s0 = inlined_call_operand.vmem [shape: f32[16,128], index: 0, kind: input, shape index: {}]   ;;  %s282_s1 = inlined_call_operand.vmem [shape: bf16[128,128], index: 1, kind: input, shape index: {}]   ;;  %s283_s2 = inlined_call_operand.vmem [shape: bf16[16,128], index: 2, kind: output, shape index: {}]  }
   0x1   :  { %v18_v0 = vld [vmem:[%s281_s0] sm:$0xff]  ;;  %v19_v1 = vld [vmem:[%s281_s0 + $0x8] sm:$0xff]  ;;  %197 = vmatprep.subr.bf16.mxu0 %v231_v2  ;;  %v219_v4 = vld [vmem:[%s282_s1 + $0x38] sm:$0xff]   ;;  %213 = vmatprep.mubr.msk.bf16.mxu0 %vm232_vm0, %v231_v2 }
   0x2   :  { %v20_v3 = vmul.f32 %v18_v0, %v18_v0  ;;  %v21_v5 = vmul.f32 %v19_v1, %v19_v1  ;;  %198 = vmatpush3.bf16.msra.mxu0 %v219_v4  ;;  %v220_v6 = vld [vmem:[%s282_s1 + $0x30] sm:$0xff]   ;;  %v221_v7 = vld [vmem:[%s282_s1 + $0x28] sm:$0xff]   ;;  %v222_v8 = vld [vmem:[%s282_s1 + $0x20] sm:$0xff]  }
   0x3   :  { %199 = vmatprep.subr.bf16.mxu0 %v231_v2  ;;  %v223_v9 = vld [vmem:[%s282_s1 + $0x18] sm:$0xff]   ;;  %v224_v10 = vld [vmem:[%s282_s1 + $0x10] sm:$0xff]   ;;  %v225_v11 = vld [vmem:[%s282_s1 + $0x8] sm:$0xff]  }
   0x4   :  { %22 = vadd.xlane.f32.xlu0 %v20_v3  ;;  %v226_v12 = vld [vmem:[%s282_s1] sm:$0xff]  }
   0x6   :  { %200 = vmatpush3.bf16.msra.mxu0 %v220_v6 }
   0x7   :  { %201 = vmatprep.subr.bf16.mxu0 %v231_v2 }
   0x8   :  { %24 = vadd.xlane.f32.xlu0 %v21_v5 }
   0xa   :  { %202 = vmatpush3.bf16.msra.mxu0 %v221_v7 }
   0xb   :  { %203 = vmatprep.subr.bf16.mxu0 %v231_v2 }
   0xe   :  { %204 = vmatpush3.bf16.msra.mxu0 %v222_v8 }
   0xf   :  { %205 = vmatprep.subr.bf16.mxu0 %v231_v2 }
  0x12   :  { %206 = vmatpush3.bf16.msra.mxu0 %v223_v9 }
  0x13   :  { %207 = vmatprep.subr.bf16.mxu0 %v231_v2 }
  0x16   :  { %208 = vmatpush3.bf16.msra.mxu0 %v224_v10 }
  0x17   :  { %209 = vmatprep.subr.bf16.mxu0 %v231_v2 }
  0x1a   :  { %210 = vmatpush3.bf16.msra.mxu0 %v225_v11 }
  0x1b   :  { %211 = vmatprep.subr.bf16.mxu0 %v231_v2 }
  0x1e   :  { %212 = vmatpush3.bf16.msra.mxu0 %v226_v12 }
  0x8d   :  { %v23_v13 = vpop.xlane.xlu0 %22 }
  0x8e   :  { %v26_v14 = vmul.f32 0.03125, %v23_v13 }
  0x90   :  { %v28_v15 = vadd.f32 1.1920929e-07, %v26_v14 }
  0x91   :  { %v25_v16 = vpop.xlane.xlu0 %24 }
  0x92   :  { %227 = vrsqrt.f32 %v28_v15  ;;  %v27_v17 = vmul.f32 0.03125, %v25_v16 }
  0x94   :  { %v29_v18 = vadd.f32 1.1920929e-07, %v27_v17 }
  0x96   :  { %229 = vrsqrt.f32 %v29_v18 }
  0x9f   :  { %v228_v19 = vpop.eup %227 }
  0xa0   :  { %v32_v20 = vmul.f32 %v228_v19, %v18_v0 }
  0xa2   :  { %v34_v23 = vmul.f32 0.70710677, %v32_v20 }
  0xa3   :  { %v230_v21 = vpop.eup %229 }
  0xa4   :  { %v33_v22 = vmul.f32 %v230_v21, %v19_v1 }
  0xa6   :  { %v35_v24 = vmul.f32 0.70710677, %v33_v22 }
  0xa8   :  { %v36_v25 = vpack.c.bf16 %v35_v24, %v34_v23 }
  0xaa   :  { %214 = vmatmul.mubr.bf16.vlgmr.msra.gmra.mxu0 %v36_v25 }
 0x16a   :  { %v137_v26 = vpop.f32.mrf.mxu0 }
 0x16b   :  { %v153_v28 = vmax.f32 %v137_v26, 0.0 }
 0x16c   :  { %v215_v27 = vpop.f32.mrf.mxu0 }
 0x16d   :  { %v155_v32 = vmul.f32 %v153_v28, %v153_v28 }
 0x16e   :  { %v140_v29 = vpop.f32.mrf.mxu0 }
 0x16f   :  { %v154_v30 = vmax.f32 %v140_v29, 0.0 }
 0x170   :  { %v216_v31 = vpop.f32.mrf.mxu0 }
 0x171   :  { %v156_v33 = vmul.f32 %v154_v30, %v154_v30 }
 0x173   :  { %v186_v34 = vpack.c.bf16 %v156_v33, %v155_v32 }
 0x175   :  { %187 = vst [vmem:[%s283_s2] sm:$0xff] %v186_v34  }

// kernel: model_forward.27
= control target key start
LH: loop header
LB: loop body
LE: loop exit
PB: predicated region body
PF: predicated region fallthrough
CT: control target
= control target key end

     0   :  { %v208_v2 = vmov 0.0   ;;  %vm209_vm0 = vmmov 0   ;;  %s261_s0 = inlined_call_operand.vmem [shape: f32[16,128], index: 0, kind: input, shape index: {}]   ;;  %s262_s1 = inlined_call_operand.vmem [shape: bf16[128,128], index: 1, kind: input, shape index: {}]   ;;  %s263_s2 = inlined_call_operand.vmem [shape: f32[16,128], index: 2, kind: output, shape index: {}]  }
   0x1   :  { %v18_v0 = vld [vmem:[%s261_s0] sm:$0xff]  ;;  %v19_v1 = vld [vmem:[%s261_s0 + $0x8] sm:$0xff]  ;;  %174 = vmatprep.subr.bf16.mxu0 %v208_v2  ;;  %v196_v4 = vld [vmem:[%s262_s1 + $0x38] sm:$0xff]   ;;  %190 = vmatprep.mubr.msk.bf16.mxu0 %vm209_vm0, %v208_v2 }
   0x2   :  { %v20_v3 = vmul.f32 %v18_v0, %v18_v0  ;;  %v197_v5 = vld [vmem:[%s262_s1 + $0x30] sm:$0xff]   ;;  %v21_v6 = vmul.f32 %v19_v1, %v19_v1  ;;  %175 = vmatpush3.bf16.msra.mxu0 %v196_v4  ;;  %v198_v7 = vld [vmem:[%s262_s1 + $0x28] sm:$0xff]   ;;  %v199_v8 = vld [vmem:[%s262_s1 + $0x20] sm:$0xff]  }
   0x3   :  { %176 = vmatprep.subr.bf16.mxu0 %v208_v2  ;;  %v200_v9 = vld [vmem:[%s262_s1 + $0x18] sm:$0xff]   ;;  %v201_v10 = vld [vmem:[%s262_s1 + $0x10] sm:$0xff]   ;;  %v202_v11 = vld [vmem:[%s262_s1 + $0x8] sm:$0xff]  }
   0x4   :  { %22 = vadd.xlane.f32.xlu0 %v20_v3  ;;  %v203_v12 = vld [vmem:[%s262_s1] sm:$0xff]  }
   0x6   :  { %177 = vmatpush3.bf16.msra.mxu0 %v197_v5 }
   0x7   :  { %178 = vmatprep.subr.bf16.mxu0 %v208_v2 }
   0x8   :  { %24 = vadd.xlane.f32.xlu0 %v21_v6 }
   0xa   :  { %179 = vmatpush3.bf16.msra.mxu0 %v198_v7 }
   0xb   :  { %180 = vmatprep.subr.bf16.mxu0 %v208_v2 }
   0xe   :  { %181 = vmatpush3.bf16.msra.mxu0 %v199_v8 }
   0xf   :  { %182 = vmatprep.subr.bf16.mxu0 %v208_v2 }
  0x12   :  { %183 = vmatpush3.bf16.msra.mxu0 %v200_v9 }
  0x13   :  { %184 = vmatprep.subr.bf16.mxu0 %v208_v2 }
  0x16   :  { %185 = vmatpush3.bf16.msra.mxu0 %v201_v10 }
  0x17   :  { %186 = vmatprep.subr.bf16.mxu0 %v208_v2 }
  0x1a   :  { %187 = vmatpush3.bf16.msra.mxu0 %v202_v11 }
  0x1b   :  { %188 = vmatprep.subr.bf16.mxu0 %v208_v2 }
  0x1e   :  { %189 = vmatpush3.bf16.msra.mxu0 %v203_v12 }
  0x8d   :  { %v23_v13 = vpop.xlane.xlu0 %22 }
  0x8e   :  { %v26_v14 = vmul.f32 0.03125, %v23_v13 }
  0x90   :  { %v28_v15 = vadd.f32 1.1920929e-07, %v26_v14 }
  0x91   :  { %v25_v16 = vpop.xlane.xlu0 %24 }
  0x92   :  { %v27_v17 = vmul.f32 0.03125, %v25_v16  ;;  %204 = vrsqrt.f32 %v28_v15 }
  0x94   :  { %v29_v18 = vadd.f32 1.1920929e-07, %v27_v17 }
  0x96   :  { %206 = vrsqrt.f32 %v29_v18 }
  0x9f   :  { %v205_v19 = vpop.eup %204 }
  0xa0   :  { %v32_v21 = vmul.f32 %v205_v19, %v18_v0 }
  0xa3   :  { %v207_v20 = vpop.eup %206 }
  0xa4   :  { %v33_v22 = vmul.f32 %v207_v20, %v19_v1 }
  0xa6   :  { %v34_v23 = vpack.c.bf16 %v33_v22, %v32_v21 }
  0xa8   :  { %191 = vmatmul.mubr.bf16.vlgmr.msra.gmra.mxu0 %v34_v23 }
 0x168   :  { %v135_v24 = vpop.f32.mrf.mxu0 }
 0x169   :  { %151 = vst [vmem:[%s263_s2] sm:$0xff] %v135_v24 }
 0x16a   :  { %v192_v25 = vpop.f32.mrf.mxu0 }
 0x16c   :  { %v138_v26 = vpop.f32.mrf.mxu0 }
 0x16d   :  { %152 = vst [vmem:[%s263_s2 + $0x8] sm:$0xff] %v138_v26 }
 0x16e   :  { %v193_v27 = vpop.f32.mrf.mxu0 }

</bundles_post_ra>
